<compile_context>
chip_gen: v5e
topology: v5e:2x2
jax: 0.10.0
libtpu: 0.0.40
codegen_flags: <defaults>
</compile_context>

<pallas_src>
import functools

import numpy as np

import jax
import jax.numpy as jnp
from jax.experimental import pallas as pl
from jax.experimental.pallas import tpu as pltpu


_RCH = 64  # row chunk (multiple of 8): bounds live vreg pressure to ~8-16 vregs


def _down_block_kernel(x_ref, w_ref, b_ref, *refs, W, OH, KH, P,
                       use_norm, use_pool, negative_slope, eps):
    # refs = ([gamma_ref, beta_ref,] [spool_ref,] out_ref, acc_ref)
    if use_norm and use_pool:
        gamma_ref, beta_ref, spool_ref, out_ref, acc_ref = refs
    elif use_norm:
        gamma_ref, beta_ref, out_ref, acc_ref = refs
    elif use_pool:
        spool_ref, out_ref, acc_ref = refs
    else:
        out_ref, acc_ref = refs            # acc_ref unused on this fully-fused path

    OCt = w_ref.shape[2]                   # per-step output-channel tile (128)
    Rw = OH * W                            # "wide" spatial extent (ow >= OW is zero)
    chunks = [(r0, min(_RCH, Rw - r0)) for r0 in range(0, Rw, _RCH)]

    if use_norm:
        s1 = jnp.zeros((1, OCt), jnp.float32)
        s2 = jnp.zeros((1, OCt), jnp.float32)

    # ---- pass 1: conv, row-chunked (KH matmuls with K = KW*Cin per chunk), fused
    #      with either one-pass norm statistics or (no norm) bias+LeakyReLU+store ----
    for r0, sz in chunks:
        acc = jnp.zeros((sz, OCt), jnp.float32)
        for kh in range(KH):
            tap = x_ref[0, kh * W + r0: kh * W + r0 + sz, :]        # bf16, aligned
            acc = acc + jnp.dot(tap, w_ref[kh],
                                preferred_element_type=jnp.float32)
        if use_norm:
            acc_ref[r0:r0 + sz, :] = acc
            s1 = s1 + jnp.sum(acc, axis=0, keepdims=True)
            s2 = s2 + jnp.sum(acc * acc, axis=0, keepdims=True)
        else:
            y = acc + b_ref[...]
            y = jnp.where(y >= 0, y, negative_slope * y)
            if use_pool:
                acc_ref[r0:r0 + sz, :] = y
            else:
                out_ref[0, r0:r0 + sz, :] = y.astype(out_ref.dtype)

    # ---- pass 2 (norm only): fused InstanceNorm affine + LeakyReLU.  Garbage
    #      columns are exact zeros, so dividing the plain sums by the valid count P
    #      gives exact stats; the conv bias cancels under InstanceNorm. ----
    if use_norm:
        inv_p = 1.0 / float(P)
        mean = s1 * inv_p
        var = s2 * inv_p - mean * mean
        scale = gamma_ref[...] * jax.lax.rsqrt(var + eps)            # (1, OCt)
        shift = beta_ref[...] - mean * scale
        for r0, sz in chunks:
            y = acc_ref[r0:r0 + sz, :] * scale + shift
            y = jnp.where(y >= 0, y, negative_slope * y)
            if use_pool:
                acc_ref[r0:r0 + sz, :] = y
            else:
                out_ref[0, r0:r0 + sz, :] = y.astype(out_ref.dtype)

    # ---- avg-pool 2x2: one selection matmul over all windows (weights are 0.25,
    #      zero at garbage columns so they never contribute) ----
    if use_pool:
        pooled = jnp.dot(spool_ref[...], acc_ref[...],
                         preferred_element_type=jnp.float32)
        out_ref[0, :, :] = pooled.astype(out_ref.dtype)


def down_block_2d(x, w, b, gamma=None, beta=None, *, norm=False, pool=False,
                  negative_slope=0.2, eps=1e-5,
                  matmul_dtype=jnp.bfloat16, out_dtype=jnp.bfloat16):
    """x: (N, Cin, H, W); w: (OC, Cin, KH, KW); b/gamma/beta: (OC,)."""
    N, Cin, H, W = x.shape
    OC, Cin_w, KH, KW = w.shape
    assert Cin == Cin_w
    assert KH <= H and KW <= W
    if norm:
        assert gamma is not None and beta is not None
    OH, OW = H - KH + 1, W - KW + 1
    if pool:
        assert OH >= 2 and OW >= 2
    P = OH * OW                              # valid conv output positions
    Rw = OH * W                              # wide spatial extent
    Kin = KW * Cin                           # fattened MXU contraction dim

    OC_TILE = 128                            # N tile; 256 fills v6e/v7x MXU for big OC
    OCp = ((OC + OC_TILE - 1) // OC_TILE) * OC_TILE
    JOC = OCp // OC_TILE

    # Width-only im2col, channels last, bf16.  Columns ow >= OW are exact zeros so
    # garbage rows of the wide conv output are exactly zero (norm stats stay exact).
    xhw = jnp.transpose(x, (0, 2, 3, 1))                                # (N,H,W,Cin)
    xw = jnp.concatenate([xhw[:, :, kw:kw + OW, :] for kw in range(KW)], axis=-1)
    xw = jnp.pad(xw, ((0, 0), (0, 0), (0, W - OW), (0, 0)))             # (N,H,W,Kin)
    xw = xw.reshape(N, H * W, Kin).astype(matmul_dtype)

    # Weights: (OC, Cin, KH, KW) -> (KH, KW*Cin, OCp), zero-padded, bf16 for the MXU.
    wt = jnp.transpose(w, (2, 3, 1, 0)).reshape(KH, Kin, OC)
    wt = jnp.pad(wt, ((0, 0), (0, 0), (0, OCp - OC))).astype(matmul_dtype)
    brow = jnp.pad(b.reshape(1, OC).astype(jnp.float32), ((0, 0), (0, OCp - OC)))

    args = [xw, wt, brow]
    in_specs = [
        pl.BlockSpec((1, H * W, Kin), lambda n, j: (n, 0, 0)),
        pl.BlockSpec((KH, Kin, OC_TILE), lambda n, j: (0, 0, j)),
        pl.BlockSpec((1, OC_TILE), lambda n, j: (0, j)),
    ]
    if norm:
        grow = jnp.pad(gamma.reshape(1, OC).astype(jnp.float32), ((0, 0), (0, OCp - OC)))
        berow = jnp.pad(beta.reshape(1, OC).astype(jnp.float32), ((0, 0), (0, OCp - OC)))
        args += [grow, berow]
        in_specs += [pl.BlockSpec((1, OC_TILE), lambda n, j: (0, j)),
                     pl.BlockSpec((1, OC_TILE), lambda n, j: (0, j))]

    if pool:
        PH, PW2 = OH // 2, OW // 2
        P_out = PH * PW2
        sp = np.zeros((P_out, Rw), np.float32)       # 4 taps of 0.25 per output row
        for ph in range(PH):
            for pw in range(PW2):
                r = ph * PW2 + pw
                for dh in range(2):
                    for dw in range(2):
                        sp[r, (2 * ph + dh) * W + (2 * pw + dw)] = 0.25
        args.append(jnp.asarray(sp))
        in_specs.append(pl.BlockSpec((P_out, Rw), lambda n, j: (0, 0)))
        rows_out = P_out
    else:
        rows_out = Rw

    kernel = functools.partial(
        _down_block_kernel, W=W, OH=OH, KH=KH, P=P,
        use_norm=norm, use_pool=pool, negative_slope=negative_slope, eps=eps)

    # Explicit VMEM budget: double-buffered blocks + f32 scratch + headroom.
    def nbytes(shape, dt):
        return int(np.prod(shape)) * jnp.dtype(dt).itemsize
    est = (2 * nbytes((H * W, Kin), matmul_dtype)
           + 2 * nbytes((KH, Kin, OC_TILE), matmul_dtype)
           + 2 * nbytes((rows_out, OC_TILE), out_dtype)
           + (2 * nbytes((P_out, Rw), jnp.float32) if pool else 0)
           + nbytes((Rw, OC_TILE), jnp.float32))
    vmem_limit = 2 * est + (8 << 20)

    out = pl.pallas_call(
        kernel,
        out_shape=jax.ShapeDtypeStruct((N, rows_out, OCp), out_dtype),
        grid_spec=pltpu.PrefetchScalarGridSpec(
            num_scalar_prefetch=0,
            grid=(N, JOC),
            in_specs=in_specs,
            out_specs=pl.BlockSpec((1, rows_out, OC_TILE), lambda n, j: (n, 0, j)),
            scratch_shapes=[pltpu.VMEM((Rw, OC_TILE), jnp.float32)],
        ),
        compiler_params=pltpu.CompilerParams(
            dimension_semantics=("parallel", "parallel"),
            vmem_limit_bytes=int(vmem_limit)),
    )(*args)

    # Wrapper-side compaction: drop lane padding and (no-pool) the wide garbage cols.
    if pool:
        out = out[:, :, :OC].reshape(N, PH, PW2, OC)
    else:
        out = out.reshape(N, OH, W, OCp)[:, :, :OW, :OC]
    return jnp.transpose(out, (0, 3, 1, 2)).astype(x.dtype)       # back to NCHW


def _reference(x, w, b, gamma, beta, *, norm, pool, negative_slope=0.2, eps=1e-5):
    y = jax.lax.conv_general_dilated(
        x, w, window_strides=(1, 1), padding='VALID',
        dimension_numbers=('NCHW', 'OIHW', 'NCHW'))
    y = y + b.reshape(1, -1, 1, 1)
    if norm:
        mean = jnp.mean(y, axis=(2, 3), keepdims=True)
        var = jnp.mean((y - mean) ** 2, axis=(2, 3), keepdims=True)
        y = (y - mean) * jax.lax.rsqrt(var + eps)
        y = y * gamma.reshape(1, -1, 1, 1) + beta.reshape(1, -1, 1, 1)
    y = jnp.where(y >= 0, y, negative_slope * y)
    if pool:
        N, C, H, W = y.shape
        y = y[:, :, :H // 2 * 2, :W // 2 * 2]
        y = y.reshape(N, C, H // 2, 2, W // 2, 2).mean(axis=(3, 5))
    return y


if __name__ == "__main__":
    key = jax.random.PRNGKey(0)
    k_x, k_w, k_b = jax.random.split(key, 3)

    N, Cin, H, W = 2, 4, 16, 16
    OC, ksize = 8, 4

    x = jax.random.normal(k_x, (N, Cin, H, W), dtype=jnp.float32)
    w = jax.random.normal(k_w, (OC, Cin, ksize, ksize), dtype=jnp.float32) * 0.1
    b = jax.random.normal(k_b, (OC,), dtype=jnp.float32) * 0.1
    gamma = jnp.ones((OC,), dtype=jnp.float32)   # InstanceNorm2d affine init
    beta = jnp.zeros((OC,), dtype=jnp.float32)

    # Full block: conv -> InstanceNorm -> LeakyReLU -> AvgPool.  bf16 MXU operands
    # and bf16 HBM writeback (f32 accumulation / norm math inside the kernel).
    out = down_block_2d(x, w, b, gamma, beta, norm=True, pool=True)
    out = jax.block_until_ready(out)
    ref = _reference(x, w, b, gamma, beta, norm=True, pool=True)
    assert out.shape == ref.shape, (out.shape, ref.shape)
    err = float(jnp.max(jnp.abs(out - ref)))
    assert jnp.allclose(out, ref, atol=3e-2, rtol=3e-2), err   # bf16 operand/store tol

    # Plain path (conv -> LeakyReLU): f32 operands/store only for a tight numerical
    # check -- f32 matmul takes the slower emulated MXU path; keep bf16 in production.
    out2 = down_block_2d(x, w, b, norm=False, pool=False,
                         matmul_dtype=jnp.float32, out_dtype=jnp.float32)
    out2 = jax.block_until_ready(out2)
    ref2 = _reference(x, w, b, gamma, beta, norm=False, pool=False)
    assert out2.shape == ref2.shape, (out2.shape, ref2.shape)
    err2 = float(jnp.max(jnp.abs(out2 - ref2)))
    assert jnp.allclose(out2, ref2, atol=1e-3, rtol=1e-3), err2

    print("KERNEL_OK")
</pallas_src>

<mosaic_0001>
module attributes {stable_mosaic.version = 11 : i64} {
  func.func @_down_block_kernel(%arg0: i32, %arg1: i32, %arg2: memref<1x256x16xbf16, #tpu.memory_space<vmem>>, %arg3: memref<4x16x128xbf16, #tpu.memory_space<vmem>>, %arg4: memref<1x128xf32, #tpu.memory_space<vmem>>, %arg5: memref<1x128xf32, #tpu.memory_space<vmem>>, %arg6: memref<1x128xf32, #tpu.memory_space<vmem>>, %arg7: memref<36x208xf32, #tpu.memory_space<vmem>>, %arg8: memref<1x36x128xbf16, #tpu.memory_space<vmem>>, %arg9: memref<208x128xf32, #tpu.memory_space<vmem>>) attributes {dimension_semantics = [#tpu.dimension_semantics<parallel>, #tpu.dimension_semantics<parallel>], iteration_bounds = array<i64: 2, 1>, scalar_prefetch = 0 : i64, scratch_operands = 1 : i64, tpu.core_type = #tpu.core_type<tc>, window_params = [{transform_indices = @transform_0, window_bounds = array<i64: 1, 256, 16>}, {transform_indices = @transform_1, window_bounds = array<i64: 4, 16, 128>}, {transform_indices = @transform_2, window_bounds = array<i64: 1, 128>}, {transform_indices = @transform_3, window_bounds = array<i64: 1, 128>}, {transform_indices = @transform_4, window_bounds = array<i64: 1, 128>}, {pipeline_mode = #tpu.pipeline_mode<synchronous>, transform_indices = @transform_5, window_bounds = array<i64: 36, 208>}, {transform_indices = @transform_6, window_bounds = array<i64: 1, 36, 128>}]} {
    %cst = arith.constant 0.000000e+00 : f32
    %0 = vector.broadcast %cst : f32 to vector<1x128xf32>
    %cst_0 = arith.constant 0.000000e+00 : f32
    %1 = vector.broadcast %cst_0 : f32 to vector<1x128xf32>
    %cst_1 = arith.constant 0.000000e+00 : f32
    %2 = vector.broadcast %cst_1 : f32 to vector<64x128xf32>
    %c0 = arith.constant 0 : index
    %c0_2 = arith.constant 0 : index
    %c0_3 = arith.constant 0 : index
    %3 = vector.load %arg2[%c0, %c0_2, %c0_3] : memref<1x256x16xbf16, #tpu.memory_space<vmem>>, vector<1x64x16xbf16>
    %4 = vector.shape_cast %3 : vector<1x64x16xbf16> to vector<64x16xbf16>
    %c0_4 = arith.constant 0 : index
    %c0_5 = arith.constant 0 : index
    %c0_6 = arith.constant 0 : index
    %5 = vector.load %arg3[%c0_4, %c0_5, %c0_6] : memref<4x16x128xbf16, #tpu.memory_space<vmem>>, vector<1x16x128xbf16>
    %6 = vector.shape_cast %5 : vector<1x16x128xbf16> to vector<16x128xbf16>
    %cst_7 = arith.constant dense<0.000000e+00> : vector<64x128xf32>
    %7 = tpu.matmul %4, %6, %cst_7 {dimension_numbers = #tpu.dot_dimension_numbers<[1], [0], [0], [1], [0, 0, 1, 1], [], []>} : vector<64x16xbf16>, vector<16x128xbf16>, vector<64x128xf32> -> vector<64x128xf32>
    %8 = arith.addf %2, %7 : vector<64x128xf32>
    %c0_8 = arith.constant 0 : index
    %c16 = arith.constant 16 : index
    %c0_9 = arith.constant 0 : index
    %9 = vector.load %arg2[%c0_8, %c16, %c0_9] : memref<1x256x16xbf16, #tpu.memory_space<vmem>>, vector<1x64x16xbf16>
    %10 = vector.shape_cast %9 : vector<1x64x16xbf16> to vector<64x16xbf16>
    %c1 = arith.constant 1 : index
    %c0_10 = arith.constant 0 : index
    %c0_11 = arith.constant 0 : index
    %11 = vector.load %arg3[%c1, %c0_10, %c0_11] : memref<4x16x128xbf16, #tpu.memory_space<vmem>>, vector<1x16x128xbf16>
    %12 = vector.shape_cast %11 : vector<1x16x128xbf16> to vector<16x128xbf16>
    %cst_12 = arith.constant dense<0.000000e+00> : vector<64x128xf32>
    %13 = tpu.matmul %10, %12, %cst_12 {dimension_numbers = #tpu.dot_dimension_numbers<[1], [0], [0], [1], [0, 0, 1, 1], [], []>} : vector<64x16xbf16>, vector<16x128xbf16>, vector<64x128xf32> -> vector<64x128xf32>
    %14 = arith.addf %8, %13 : vector<64x128xf32>
    %c0_13 = arith.constant 0 : index
    %c32 = arith.constant 32 : index
    %c0_14 = arith.constant 0 : index
    %15 = vector.load %arg2[%c0_13, %c32, %c0_14] : memref<1x256x16xbf16, #tpu.memory_space<vmem>>, vector<1x64x16xbf16>
    %16 = vector.shape_cast %15 : vector<1x64x16xbf16> to vector<64x16xbf16>
    %c2 = arith.constant 2 : index
    %c0_15 = arith.constant 0 : index
    %c0_16 = arith.constant 0 : index
    %17 = vector.load %arg3[%c2, %c0_15, %c0_16] : memref<4x16x128xbf16, #tpu.memory_space<vmem>>, vector<1x16x128xbf16>
    %18 = vector.shape_cast %17 : vector<1x16x128xbf16> to vector<16x128xbf16>
    %cst_17 = arith.constant dense<0.000000e+00> : vector<64x128xf32>
    %19 = tpu.matmul %16, %18, %cst_17 {dimension_numbers = #tpu.dot_dimension_numbers<[1], [0], [0], [1], [0, 0, 1, 1], [], []>} : vector<64x16xbf16>, vector<16x128xbf16>, vector<64x128xf32> -> vector<64x128xf32>
    %20 = arith.addf %14, %19 : vector<64x128xf32>
    %c0_18 = arith.constant 0 : index
    %c48 = arith.constant 48 : index
    %c0_19 = arith.constant 0 : index
    %21 = vector.load %arg2[%c0_18, %c48, %c0_19] : memref<1x256x16xbf16, #tpu.memory_space<vmem>>, vector<1x64x16xbf16>
    %22 = vector.shape_cast %21 : vector<1x64x16xbf16> to vector<64x16xbf16>
    %c3 = arith.constant 3 : index
    %c0_20 = arith.constant 0 : index
    %c0_21 = arith.constant 0 : index
    %23 = vector.load %arg3[%c3, %c0_20, %c0_21] : memref<4x16x128xbf16, #tpu.memory_space<vmem>>, vector<1x16x128xbf16>
    %24 = vector.shape_cast %23 : vector<1x16x128xbf16> to vector<16x128xbf16>
    %cst_22 = arith.constant dense<0.000000e+00> : vector<64x128xf32>
    %25 = tpu.matmul %22, %24, %cst_22 {dimension_numbers = #tpu.dot_dimension_numbers<[1], [0], [0], [1], [0, 0, 1, 1], [], []>} : vector<64x16xbf16>, vector<16x128xbf16>, vector<64x128xf32> -> vector<64x128xf32>
    %26 = arith.addf %20, %25 : vector<64x128xf32>
    %c0_23 = arith.constant 0 : index
    %c0_24 = arith.constant 0 : index
    %27 = vector.load %arg9[%c0_23, %c0_24] : memref<208x128xf32, #tpu.memory_space<vmem>>, vector<64x128xf32>
    tpu.vector_store %arg9[%c0_23, %c0_24], %26 {strides = array<i32>} : memref<208x128xf32, #tpu.memory_space<vmem>>, vector<64x128xf32>,
    %cst_25 = arith.constant dense<0.000000e+00> : vector<128xf32>
    %28 = vector.multi_reduction <add>, %26, %cst_25 [0] : vector<64x128xf32> to vector<128xf32>
    %29 = vector.shape_cast %28 : vector<128xf32> to vector<1x128xf32>
    %30 = arith.addf %0, %29 : vector<1x128xf32>
    %31 = arith.mulf %26, %26 : vector<64x128xf32>
    %cst_26 = arith.constant dense<0.000000e+00> : vector<128xf32>
    %32 = vector.multi_reduction <add>, %31, %cst_26 [0] : vector<64x128xf32> to vector<128xf32>
    %33 = vector.shape_cast %32 : vector<128xf32> to vector<1x128xf32>
    %34 = arith.addf %1, %33 : vector<1x128xf32>
    %cst_27 = arith.constant 0.000000e+00 : f32
    %35 = vector.broadcast %cst_27 : f32 to vector<64x128xf32>
    %c0_28 = arith.constant 0 : index
    %c64 = arith.constant 64 : index
    %c0_29 = arith.constant 0 : index
    %36 = vector.load %arg2[%c0_28, %c64, %c0_29] : memref<1x256x16xbf16, #tpu.memory_space<vmem>>, vector<1x64x16xbf16>
    %37 = vector.shape_cast %36 : vector<1x64x16xbf16> to vector<64x16xbf16>
    %c0_30 = arith.constant 0 : index
    %c0_31 = arith.constant 0 : index
    %c0_32 = arith.constant 0 : index
    %38 = vector.load %arg3[%c0_30, %c0_31, %c0_32] : memref<4x16x128xbf16, #tpu.memory_space<vmem>>, vector<1x16x128xbf16>
    %39 = vector.shape_cast %38 : vector<1x16x128xbf16> to vector<16x128xbf16>
    %cst_33 = arith.constant dense<0.000000e+00> : vector<64x128xf32>
    %40 = tpu.matmul %37, %39, %cst_33 {dimension_numbers = #tpu.dot_dimension_numbers<[1], [0], [0], [1], [0, 0, 1, 1], [], []>} : vector<64x16xbf16>, vector<16x128xbf16>, vector<64x128xf32> -> vector<64x128xf32>
    %41 = arith.addf %35, %40 : vector<64x128xf32>
    %c0_34 = arith.constant 0 : index
    %c80 = arith.constant 80 : index
    %c0_35 = arith.constant 0 : index
    %42 = vector.load %arg2[%c0_34, %c80, %c0_35] : memref<1x256x16xbf16, #tpu.memory_space<vmem>>, vector<1x64x16xbf16>
    %43 = vector.shape_cast %42 : vector<1x64x16xbf16> to vector<64x16xbf16>
    %c1_36 = arith.constant 1 : index
    %c0_37 = arith.constant 0 : index
    %c0_38 = arith.constant 0 : index
    %44 = vector.load %arg3[%c1_36, %c0_37, %c0_38] : memref<4x16x128xbf16, #tpu.memory_space<vmem>>, vector<1x16x128xbf16>
    %45 = vector.shape_cast %44 : vector<1x16x128xbf16> to vector<16x128xbf16>
    %cst_39 = arith.constant dense<0.000000e+00> : vector<64x128xf32>
    %46 = tpu.matmul %43, %45, %cst_39 {dimension_numbers = #tpu.dot_dimension_numbers<[1], [0], [0], [1], [0, 0, 1, 1], [], []>} : vector<64x16xbf16>, vector<16x128xbf16>, vector<64x128xf32> -> vector<64x128xf32>
    %47 = arith.addf %41, %46 : vector<64x128xf32>
    %c0_40 = arith.constant 0 : index
    %c96 = arith.constant 96 : index
    %c0_41 = arith.constant 0 : index
    %48 = vector.load %arg2[%c0_40, %c96, %c0_41] : memref<1x256x16xbf16, #tpu.memory_space<vmem>>, vector<1x64x16xbf16>
    %49 = vector.shape_cast %48 : vector<1x64x16xbf16> to vector<64x16xbf16>
    %c2_42 = arith.constant 2 : index
    %c0_43 = arith.constant 0 : index
    %c0_44 = arith.constant 0 : index
    %50 = vector.load %arg3[%c2_42, %c0_43, %c0_44] : memref<4x16x128xbf16, #tpu.memory_space<vmem>>, vector<1x16x128xbf16>
    %51 = vector.shape_cast %50 : vector<1x16x128xbf16> to vector<16x128xbf16>
    %cst_45 = arith.constant dense<0.000000e+00> : vector<64x128xf32>
    %52 = tpu.matmul %49, %51, %cst_45 {dimension_numbers = #tpu.dot_dimension_numbers<[1], [0], [0], [1], [0, 0, 1, 1], [], []>} : vector<64x16xbf16>, vector<16x128xbf16>, vector<64x128xf32> -> vector<64x128xf32>
    %53 = arith.addf %47, %52 : vector<64x128xf32>
    %c0_46 = arith.constant 0 : index
    %c112 = arith.constant 112 : index
    %c0_47 = arith.constant 0 : index
    %54 = vector.load %arg2[%c0_46, %c112, %c0_47] : memref<1x256x16xbf16, #tpu.memory_space<vmem>>, vector<1x64x16xbf16>
    %55 = vector.shape_cast %54 : vector<1x64x16xbf16> to vector<64x16xbf16>
    %c3_48 = arith.constant 3 : index
    %c0_49 = arith.constant 0 : index
    %c0_50 = arith.constant 0 : index
    %56 = vector.load %arg3[%c3_48, %c0_49, %c0_50] : memref<4x16x128xbf16, #tpu.memory_space<vmem>>, vector<1x16x128xbf16>
    %57 = vector.shape_cast %56 : vector<1x16x128xbf16> to vector<16x128xbf16>
    %cst_51 = arith.constant dense<0.000000e+00> : vector<64x128xf32>
    %58 = tpu.matmul %55, %57, %cst_51 {dimension_numbers = #tpu.dot_dimension_numbers<[1], [0], [0], [1], [0, 0, 1, 1], [], []>} : vector<64x16xbf16>, vector<16x128xbf16>, vector<64x128xf32> -> vector<64x128xf32>
    %59 = arith.addf %53, %58 : vector<64x128xf32>
    %c64_52 = arith.constant 64 : index
    %c0_53 = arith.constant 0 : index
    %60 = vector.load %arg9[%c64_52, %c0_53] : memref<208x128xf32, #tpu.memory_space<vmem>>, vector<64x128xf32>
    tpu.vector_store %arg9[%c64_52, %c0_53], %59 {strides = array<i32>} : memref<208x128xf32, #tpu.memory_space<vmem>>, vector<64x128xf32>,
    %cst_54 = arith.constant dense<0.000000e+00> : vector<128xf32>
    %61 = vector.multi_reduction <add>, %59, %cst_54 [0] : vector<64x128xf32> to vector<128xf32>
    %62 = vector.shape_cast %61 : vector<128xf32> to vector<1x128xf32>
    %63 = arith.addf %30, %62 : vector<1x128xf32>
    %64 = arith.mulf %59, %59 : vector<64x128xf32>
    %cst_55 = arith.constant dense<0.000000e+00> : vector<128xf32>
    %65 = vector.multi_reduction <add>, %64, %cst_55 [0] : vector<64x128xf32> to vector<128xf32>
    %66 = vector.shape_cast %65 : vector<128xf32> to vector<1x128xf32>
    %67 = arith.addf %34, %66 : vector<1x128xf32>
    %cst_56 = arith.constant 0.000000e+00 : f32
    %68 = vector.broadcast %cst_56 : f32 to vector<64x128xf32>
    %c0_57 = arith.constant 0 : index
    %c128 = arith.constant 128 : index
    %c0_58 = arith.constant 0 : index
    %69 = vector.load %arg2[%c0_57, %c128, %c0_58] : memref<1x256x16xbf16, #tpu.memory_space<vmem>>, vector<1x64x16xbf16>
    %70 = vector.shape_cast %69 : vector<1x64x16xbf16> to vector<64x16xbf16>
    %c0_59 = arith.constant 0 : index
    %c0_60 = arith.constant 0 : index
    %c0_61 = arith.constant 0 : index
    %71 = vector.load %arg3[%c0_59, %c0_60, %c0_61] : memref<4x16x128xbf16, #tpu.memory_space<vmem>>, vector<1x16x128xbf16>
    %72 = vector.shape_cast %71 : vector<1x16x128xbf16> to vector<16x128xbf16>
    %cst_62 = arith.constant dense<0.000000e+00> : vector<64x128xf32>
    %73 = tpu.matmul %70, %72, %cst_62 {dimension_numbers = #tpu.dot_dimension_numbers<[1], [0], [0], [1], [0, 0, 1, 1], [], []>} : vector<64x16xbf16>, vector<16x128xbf16>, vector<64x128xf32> -> vector<64x128xf32>
    %74 = arith.addf %68, %73 : vector<64x128xf32>
    %c0_63 = arith.constant 0 : index
    %c144 = arith.constant 144 : index
    %c0_64 = arith.constant 0 : index
    %75 = vector.load %arg2[%c0_63, %c144, %c0_64] : memref<1x256x16xbf16, #tpu.memory_space<vmem>>, vector<1x64x16xbf16>
    %76 = vector.shape_cast %75 : vector<1x64x16xbf16> to vector<64x16xbf16>
    %c1_65 = arith.constant 1 : index
    %c0_66 = arith.constant 0 : index
    %c0_67 = arith.constant 0 : index
    %77 = vector.load %arg3[%c1_65, %c0_66, %c0_67] : memref<4x16x128xbf16, #tpu.memory_space<vmem>>, vector<1x16x128xbf16>
    %78 = vector.shape_cast %77 : vector<1x16x128xbf16> to vector<16x128xbf16>
    %cst_68 = arith.constant dense<0.000000e+00> : vector<64x128xf32>
    %79 = tpu.matmul %76, %78, %cst_68 {dimension_numbers = #tpu.dot_dimension_numbers<[1], [0], [0], [1], [0, 0, 1, 1], [], []>} : vector<64x16xbf16>, vector<16x128xbf16>, vector<64x128xf32> -> vector<64x128xf32>
    %80 = arith.addf %74, %79 : vector<64x128xf32>
    %c0_69 = arith.constant 0 : index
    %c160 = arith.constant 160 : index
    %c0_70 = arith.constant 0 : index
    %81 = vector.load %arg2[%c0_69, %c160, %c0_70] : memref<1x256x16xbf16, #tpu.memory_space<vmem>>, vector<1x64x16xbf16>
    %82 = vector.shape_cast %81 : vector<1x64x16xbf16> to vector<64x16xbf16>
    %c2_71 = arith.constant 2 : index
    %c0_72 = arith.constant 0 : index
    %c0_73 = arith.constant 0 : index
    %83 = vector.load %arg3[%c2_71, %c0_72, %c0_73] : memref<4x16x128xbf16, #tpu.memory_space<vmem>>, vector<1x16x128xbf16>
    %84 = vector.shape_cast %83 : vector<1x16x128xbf16> to vector<16x128xbf16>
    %cst_74 = arith.constant dense<0.000000e+00> : vector<64x128xf32>
    %85 = tpu.matmul %82, %84, %cst_74 {dimension_numbers = #tpu.dot_dimension_numbers<[1], [0], [0], [1], [0, 0, 1, 1], [], []>} : vector<64x16xbf16>, vector<16x128xbf16>, vector<64x128xf32> -> vector<64x128xf32>
    %86 = arith.addf %80, %85 : vector<64x128xf32>
    %c0_75 = arith.constant 0 : index
    %c176 = arith.constant 176 : index
    %c0_76 = arith.constant 0 : index
    %87 = vector.load %arg2[%c0_75, %c176, %c0_76] : memref<1x256x16xbf16, #tpu.memory_space<vmem>>, vector<1x64x16xbf16>
    %88 = vector.shape_cast %87 : vector<1x64x16xbf16> to vector<64x16xbf16>
    %c3_77 = arith.constant 3 : index
    %c0_78 = arith.constant 0 : index
    %c0_79 = arith.constant 0 : index
    %89 = vector.load %arg3[%c3_77, %c0_78, %c0_79] : memref<4x16x128xbf16, #tpu.memory_space<vmem>>, vector<1x16x128xbf16>
    %90 = vector.shape_cast %89 : vector<1x16x128xbf16> to vector<16x128xbf16>
    %cst_80 = arith.constant dense<0.000000e+00> : vector<64x128xf32>
    %91 = tpu.matmul %88, %90, %cst_80 {dimension_numbers = #tpu.dot_dimension_numbers<[1], [0], [0], [1], [0, 0, 1, 1], [], []>} : vector<64x16xbf16>, vector<16x128xbf16>, vector<64x128xf32> -> vector<64x128xf32>
    %92 = arith.addf %86, %91 : vector<64x128xf32>
    %c128_81 = arith.constant 128 : index
    %c0_82 = arith.constant 0 : index
    %93 = vector.load %arg9[%c128_81, %c0_82] : memref<208x128xf32, #tpu.memory_space<vmem>>, vector<64x128xf32>
    tpu.vector_store %arg9[%c128_81, %c0_82], %92 {strides = array<i32>} : memref<208x128xf32, #tpu.memory_space<vmem>>, vector<64x128xf32>,
    %cst_83 = arith.constant dense<0.000000e+00> : vector<128xf32>
    %94 = vector.multi_reduction <add>, %92, %cst_83 [0] : vector<64x128xf32> to vector<128xf32>
    %95 = vector.shape_cast %94 : vector<128xf32> to vector<1x128xf32>
    %96 = arith.addf %63, %95 : vector<1x128xf32>
    %97 = arith.mulf %92, %92 : vector<64x128xf32>
    %cst_84 = arith.constant dense<0.000000e+00> : vector<128xf32>
    %98 = vector.multi_reduction <add>, %97, %cst_84 [0] : vector<64x128xf32> to vector<128xf32>
    %99 = vector.shape_cast %98 : vector<128xf32> to vector<1x128xf32>
    %100 = arith.addf %67, %99 : vector<1x128xf32>
    %cst_85 = arith.constant 0.000000e+00 : f32
    %101 = vector.broadcast %cst_85 : f32 to vector<16x128xf32>
    %c0_86 = arith.constant 0 : index
    %c192 = arith.constant 192 : index
    %c0_87 = arith.constant 0 : index
    %102 = vector.load %arg2[%c0_86, %c192, %c0_87] : memref<1x256x16xbf16, #tpu.memory_space<vmem>>, vector<1x16x16xbf16>
    %103 = vector.shape_cast %102 : vector<1x16x16xbf16> to vector<16x16xbf16>
    %c0_88 = arith.constant 0 : index
    %c0_89 = arith.constant 0 : index
    %c0_90 = arith.constant 0 : index
    %104 = vector.load %arg3[%c0_88, %c0_89, %c0_90] : memref<4x16x128xbf16, #tpu.memory_space<vmem>>, vector<1x16x128xbf16>
    %105 = vector.shape_cast %104 : vector<1x16x128xbf16> to vector<16x128xbf16>
    %cst_91 = arith.constant dense<0.000000e+00> : vector<16x128xf32>
    %106 = tpu.matmul %103, %105, %cst_91 {dimension_numbers = #tpu.dot_dimension_numbers<[1], [0], [0], [1], [0, 0, 1, 1], [], []>} : vector<16x16xbf16>, vector<16x128xbf16>, vector<16x128xf32> -> vector<16x128xf32>
    %107 = arith.addf %101, %106 : vector<16x128xf32>
    %c0_92 = arith.constant 0 : index
    %c208 = arith.constant 208 : index
    %c0_93 = arith.constant 0 : index
    %108 = vector.load %arg2[%c0_92, %c208, %c0_93] : memref<1x256x16xbf16, #tpu.memory_space<vmem>>, vector<1x16x16xbf16>
    %109 = vector.shape_cast %108 : vector<1x16x16xbf16> to vector<16x16xbf16>
    %c1_94 = arith.constant 1 : index
    %c0_95 = arith.constant 0 : index
    %c0_96 = arith.constant 0 : index
    %110 = vector.load %arg3[%c1_94, %c0_95, %c0_96] : memref<4x16x128xbf16, #tpu.memory_space<vmem>>, vector<1x16x128xbf16>
    %111 = vector.shape_cast %110 : vector<1x16x128xbf16> to vector<16x128xbf16>
    %cst_97 = arith.constant dense<0.000000e+00> : vector<16x128xf32>
    %112 = tpu.matmul %109, %111, %cst_97 {dimension_numbers = #tpu.dot_dimension_numbers<[1], [0], [0], [1], [0, 0, 1, 1], [], []>} : vector<16x16xbf16>, vector<16x128xbf16>, vector<16x128xf32> -> vector<16x128xf32>
    %113 = arith.addf %107, %112 : vector<16x128xf32>
    %c0_98 = arith.constant 0 : index
    %c224 = arith.constant 224 : index
    %c0_99 = arith.constant 0 : index
    %114 = vector.load %arg2[%c0_98, %c224, %c0_99] : memref<1x256x16xbf16, #tpu.memory_space<vmem>>, vector<1x16x16xbf16>
    %115 = vector.shape_cast %114 : vector<1x16x16xbf16> to vector<16x16xbf16>
    %c2_100 = arith.constant 2 : index
    %c0_101 = arith.constant 0 : index
    %c0_102 = arith.constant 0 : index
    %116 = vector.load %arg3[%c2_100, %c0_101, %c0_102] : memref<4x16x128xbf16, #tpu.memory_space<vmem>>, vector<1x16x128xbf16>
    %117 = vector.shape_cast %116 : vector<1x16x128xbf16> to vector<16x128xbf16>
    %cst_103 = arith.constant dense<0.000000e+00> : vector<16x128xf32>
    %118 = tpu.matmul %115, %117, %cst_103 {dimension_numbers = #tpu.dot_dimension_numbers<[1], [0], [0], [1], [0, 0, 1, 1], [], []>} : vector<16x16xbf16>, vector<16x128xbf16>, vector<16x128xf32> -> vector<16x128xf32>
    %119 = arith.addf %113, %118 : vector<16x128xf32>
    %c0_104 = arith.constant 0 : index
    %c240 = arith.constant 240 : index
    %c0_105 = arith.constant 0 : index
    %120 = vector.load %arg2[%c0_104, %c240, %c0_105] : memref<1x256x16xbf16, #tpu.memory_space<vmem>>, vector<1x16x16xbf16>
    %121 = vector.shape_cast %120 : vector<1x16x16xbf16> to vector<16x16xbf16>
    %c3_106 = arith.constant 3 : index
    %c0_107 = arith.constant 0 : index
    %c0_108 = arith.constant 0 : index
    %122 = vector.load %arg3[%c3_106, %c0_107, %c0_108] : memref<4x16x128xbf16, #tpu.memory_space<vmem>>, vector<1x16x128xbf16>
    %123 = vector.shape_cast %122 : vector<1x16x128xbf16> to vector<16x128xbf16>
    %cst_109 = arith.constant dense<0.000000e+00> : vector<16x128xf32>
    %124 = tpu.matmul %121, %123, %cst_109 {dimension_numbers = #tpu.dot_dimension_numbers<[1], [0], [0], [1], [0, 0, 1, 1], [], []>} : vector<16x16xbf16>, vector<16x128xbf16>, vector<16x128xf32> -> vector<16x128xf32>
    %125 = arith.addf %119, %124 : vector<16x128xf32>
    %c192_110 = arith.constant 192 : index
    %c0_111 = arith.constant 0 : index
    %126 = vector.load %arg9[%c192_110, %c0_111] : memref<208x128xf32, #tpu.memory_space<vmem>>, vector<16x128xf32>
    tpu.vector_store %arg9[%c192_110, %c0_111], %125 {strides = array<i32>} : memref<208x128xf32, #tpu.memory_space<vmem>>, vector<16x128xf32>,
    %cst_112 = arith.constant dense<0.000000e+00> : vector<128xf32>
    %127 = vector.multi_reduction <add>, %125, %cst_112 [0] : vector<16x128xf32> to vector<128xf32>
    %128 = vector.shape_cast %127 : vector<128xf32> to vector<1x128xf32>
    %129 = arith.addf %96, %128 : vector<1x128xf32>
    %130 = arith.mulf %125, %125 : vector<16x128xf32>
    %cst_113 = arith.constant dense<0.000000e+00> : vector<128xf32>
    %131 = vector.multi_reduction <add>, %130, %cst_113 [0] : vector<16x128xf32> to vector<128xf32>
    %132 = vector.shape_cast %131 : vector<128xf32> to vector<1x128xf32>
    %133 = arith.addf %100, %132 : vector<1x128xf32>
    %cst_114 = arith.constant 5.917160e-03 : f32
    %134 = vector.broadcast %cst_114 : f32 to vector<1x128xf32>
    %135 = arith.mulf %129, %134 : vector<1x128xf32>
    %cst_115 = arith.constant 5.917160e-03 : f32
    %136 = vector.broadcast %cst_115 : f32 to vector<1x128xf32>
    %137 = arith.mulf %133, %136 : vector<1x128xf32>
    %138 = arith.mulf %135, %135 : vector<1x128xf32>
    %139 = arith.subf %137, %138 : vector<1x128xf32>
    %c0_116 = arith.constant 0 : index
    %c0_117 = arith.constant 0 : index
    %140 = vector.load %arg5[%c0_116, %c0_117] : memref<1x128xf32, #tpu.memory_space<vmem>>, vector<1x128xf32>
    %cst_118 = arith.constant 9.99999974E-6 : f32
    %141 = vector.broadcast %cst_118 : f32 to vector<1x128xf32>
    %142 = arith.addf %139, %141 : vector<1x128xf32>
    %143 = math.rsqrt %142 : vector<1x128xf32>
    %144 = arith.mulf %140, %143 : vector<1x128xf32>
    %c0_119 = arith.constant 0 : index
    %c0_120 = arith.constant 0 : index
    %145 = vector.load %arg6[%c0_119, %c0_120] : memref<1x128xf32, #tpu.memory_space<vmem>>, vector<1x128xf32>
    %146 = arith.mulf %135, %144 : vector<1x128xf32>
    %147 = arith.subf %145, %146 : vector<1x128xf32>
    %c0_121 = arith.constant 0 : index
    %c0_122 = arith.constant 0 : index
    %148 = vector.load %arg9[%c0_121, %c0_122] : memref<208x128xf32, #tpu.memory_space<vmem>>, vector<64x128xf32>
    %149 = vector.broadcast %144 : vector<1x128xf32> to vector<64x128xf32>
    %150 = arith.mulf %148, %149 : vector<64x128xf32>
    %151 = vector.broadcast %147 : vector<1x128xf32> to vector<64x128xf32>
    %152 = arith.addf %150, %151 : vector<64x128xf32>
    %cst_123 = arith.constant 0.000000e+00 : f32
    %153 = vector.broadcast %cst_123 : f32 to vector<64x128xf32>
    %154 = arith.cmpf oge, %152, %153 : vector<64x128xf32>
    %cst_124 = arith.constant 2.000000e-01 : f32
    %155 = vector.broadcast %cst_124 : f32 to vector<64x128xf32>
    %156 = arith.mulf %155, %152 : vector<64x128xf32>
    %157 = arith.select %154, %152, %156 : vector<64x128xi1>, vector<64x128xf32>
    %c0_125 = arith.constant 0 : index
    %c0_126 = arith.constant 0 : index
    %158 = vector.load %arg9[%c0_125, %c0_126] : memref<208x128xf32, #tpu.memory_space<vmem>>, vector<64x128xf32>
    tpu.vector_store %arg9[%c0_125, %c0_126], %157 {strides = array<i32>} : memref<208x128xf32, #tpu.memory_space<vmem>>, vector<64x128xf32>,
    %c64_127 = arith.constant 64 : index
    %c0_128 = arith.constant 0 : index
    %159 = vector.load %arg9[%c64_127, %c0_128] : memref<208x128xf32, #tpu.memory_space<vmem>>, vector<64x128xf32>
    %160 = vector.broadcast %144 : vector<1x128xf32> to vector<64x128xf32>
    %161 = arith.mulf %159, %160 : vector<64x128xf32>
    %162 = vector.broadcast %147 : vector<1x128xf32> to vector<64x128xf32>
    %163 = arith.addf %161, %162 : vector<64x128xf32>
    %cst_129 = arith.constant 0.000000e+00 : f32
    %164 = vector.broadcast %cst_129 : f32 to vector<64x128xf32>
    %165 = arith.cmpf oge, %163, %164 : vector<64x128xf32>
    %cst_130 = arith.constant 2.000000e-01 : f32
    %166 = vector.broadcast %cst_130 : f32 to vector<64x128xf32>
    %167 = arith.mulf %166, %163 : vector<64x128xf32>
    %168 = arith.select %165, %163, %167 : vector<64x128xi1>, vector<64x128xf32>
    %c64_131 = arith.constant 64 : index
    %c0_132 = arith.constant 0 : index
    %169 = vector.load %arg9[%c64_131, %c0_132] : memref<208x128xf32, #tpu.memory_space<vmem>>, vector<64x128xf32>
    tpu.vector_store %arg9[%c64_131, %c0_132], %168 {strides = array<i32>} : memref<208x128xf32, #tpu.memory_space<vmem>>, vector<64x128xf32>,
    %c128_133 = arith.constant 128 : index
    %c0_134 = arith.constant 0 : index
    %170 = vector.load %arg9[%c128_133, %c0_134] : memref<208x128xf32, #tpu.memory_space<vmem>>, vector<64x128xf32>
    %171 = vector.broadcast %144 : vector<1x128xf32> to vector<64x128xf32>
    %172 = arith.mulf %170, %171 : vector<64x128xf32>
    %173 = vector.broadcast %147 : vector<1x128xf32> to vector<64x128xf32>
    %174 = arith.addf %172, %173 : vector<64x128xf32>
    %cst_135 = arith.constant 0.000000e+00 : f32
    %175 = vector.broadcast %cst_135 : f32 to vector<64x128xf32>
    %176 = arith.cmpf oge, %174, %175 : vector<64x128xf32>
    %cst_136 = arith.constant 2.000000e-01 : f32
    %177 = vector.broadcast %cst_136 : f32 to vector<64x128xf32>
    %178 = arith.mulf %177, %174 : vector<64x128xf32>
    %179 = arith.select %176, %174, %178 : vector<64x128xi1>, vector<64x128xf32>
    %c128_137 = arith.constant 128 : index
    %c0_138 = arith.constant 0 : index
    %180 = vector.load %arg9[%c128_137, %c0_138] : memref<208x128xf32, #tpu.memory_space<vmem>>, vector<64x128xf32>
    tpu.vector_store %arg9[%c128_137, %c0_138], %179 {strides = array<i32>} : memref<208x128xf32, #tpu.memory_space<vmem>>, vector<64x128xf32>,
    %c192_139 = arith.constant 192 : index
    %c0_140 = arith.constant 0 : index
    %181 = vector.load %arg9[%c192_139, %c0_140] : memref<208x128xf32, #tpu.memory_space<vmem>>, vector<16x128xf32>
    %182 = vector.broadcast %144 : vector<1x128xf32> to vector<16x128xf32>
    %183 = arith.mulf %181, %182 : vector<16x128xf32>
    %184 = vector.broadcast %147 : vector<1x128xf32> to vector<16x128xf32>
    %185 = arith.addf %183, %184 : vector<16x128xf32>
    %cst_141 = arith.constant 0.000000e+00 : f32
    %186 = vector.broadcast %cst_141 : f32 to vector<16x128xf32>
    %187 = arith.cmpf oge, %185, %186 : vector<16x128xf32>
    %cst_142 = arith.constant 2.000000e-01 : f32
    %188 = vector.broadcast %cst_142 : f32 to vector<16x128xf32>
    %189 = arith.mulf %188, %185 : vector<16x128xf32>
    %190 = arith.select %187, %185, %189 : vector<16x128xi1>, vector<16x128xf32>
    %c192_143 = arith.constant 192 : index
    %c0_144 = arith.constant 0 : index
    %191 = vector.load %arg9[%c192_143, %c0_144] : memref<208x128xf32, #tpu.memory_space<vmem>>, vector<16x128xf32>
    tpu.vector_store %arg9[%c192_143, %c0_144], %190 {strides = array<i32>} : memref<208x128xf32, #tpu.memory_space<vmem>>, vector<16x128xf32>,
    %c0_145 = arith.constant 0 : index
    %c0_146 = arith.constant 0 : index
    %192 = vector.load %arg7[%c0_145, %c0_146] : memref<36x208xf32, #tpu.memory_space<vmem>>, vector<36x208xf32>
    %c0_147 = arith.constant 0 : index
    %c0_148 = arith.constant 0 : index
    %193 = vector.load %arg9[%c0_147, %c0_148] : memref<208x128xf32, #tpu.memory_space<vmem>>, vector<208x128xf32>
    %cst_149 = arith.constant dense<0.000000e+00> : vector<36x128xf32>
    %194 = tpu.matmul %192, %193, %cst_149 {dimension_numbers = #tpu.dot_dimension_numbers<[1], [0], [0], [1], [0, 0, 1, 1], [], []>} : vector<36x208xf32>, vector<208x128xf32>, vector<36x128xf32> -> vector<36x128xf32>
    %195 = arith.truncf %194 : vector<36x128xf32> to vector<36x128xbf16>
    %c0_150 = arith.constant 0 : index
    %c0_151 = arith.constant 0 : index
    %c0_152 = arith.constant 0 : index
    %196 = vector.load %arg8[%c0_150, %c0_151, %c0_152] : memref<1x36x128xbf16, #tpu.memory_space<vmem>>, vector<1x36x128xbf16>
    %197 = vector.shape_cast %196 : vector<1x36x128xbf16> to vector<36x128xbf16>
    %198 = vector.shape_cast %195 : vector<36x128xbf16> to vector<1x36x128xbf16>
    tpu.vector_store %arg8[%c0_150, %c0_151, %c0_152], %198 {strides = array<i32>} : memref<1x36x128xbf16, #tpu.memory_space<vmem>>, vector<1x36x128xbf16>,
    return
  }
  func.func @transform_0(%arg0: i32, %arg1: i32) -> (i32, i32, i32) {
    %c0_i32 = arith.constant 0 : i32
    %c0_i32_0 = arith.constant 0 : i32
    %c0_i32_1 = arith.constant 0 : i32
    return %arg0, %c0_i32, %c0_i32_0 : i32, i32, i32
  }
  func.func @transform_1(%arg0: i32, %arg1: i32) -> (i32, i32, i32) {
    %c0_i32 = arith.constant 0 : i32
    %c0_i32_0 = arith.constant 0 : i32
    %c0_i32_1 = arith.constant 0 : i32
    return %c0_i32, %c0_i32_0, %arg1 : i32, i32, i32
  }
  func.func @transform_2(%arg0: i32, %arg1: i32) -> (i32, i32) {
    %c0_i32 = arith.constant 0 : i32
    %c0_i32_0 = arith.constant 0 : i32
    return %c0_i32, %arg1 : i32, i32
  }
  func.func @transform_3(%arg0: i32, %arg1: i32) -> (i32, i32) {
    %c0_i32 = arith.constant 0 : i32
    %c0_i32_0 = arith.constant 0 : i32
    return %c0_i32, %arg1 : i32, i32
  }
  func.func @transform_4(%arg0: i32, %arg1: i32) -> (i32, i32) {
    %c0_i32 = arith.constant 0 : i32
    %c0_i32_0 = arith.constant 0 : i32
    return %c0_i32, %arg1 : i32, i32
  }
  func.func @transform_5(%arg0: i32, %arg1: i32) -> (i32, i32) {
    %c0_i32 = arith.constant 0 : i32
    %c0_i32_0 = arith.constant 0 : i32
    %c0_i32_1 = arith.constant 0 : i32
    return %c0_i32, %c0_i32_0 : i32, i32
  }
  func.func @transform_6(%arg0: i32, %arg1: i32) -> (i32, i32, i32) {
    %c0_i32 = arith.constant 0 : i32
    %c0_i32_0 = arith.constant 0 : i32
    return %arg0, %c0_i32, %arg1 : i32, i32, i32
  }
}

</mosaic_0001>

<bundles_post_ra>
// kernel: tpu_custom_call.1
= control target key start
LH: loop header
LB: loop body
LE: loop exit
PB: predicated region body
PF: predicated region fallthrough
CT: control target
= control target key end

     0   :  { %s2453_s21 = smov 0   ;;  %s2455_s22 = smov 0   ;;  %s2890_s0 = inlined_call_operand.vmem [shape: bf16[2,256,16], index: 0, kind: input, shape index: {}]   ;;  %s2891_s1 = inlined_call_operand.vmem [shape: bf16[4,16,128], index: 1, kind: input, shape index: {}]   ;;  %s2892_s2 = inlined_call_operand.vmem [shape: f32[1,128], index: 2, kind: input, shape index: {}]   ;;  %s2893_s3 = inlined_call_operand.vmem [shape: f32[1,128], index: 3, kind: input, shape index: {}]   ;;  %s2894_s4 = inlined_call_operand.vmem [shape: f32[1,128], index: 4, kind: input, shape index: {}]   ;;  %s2895_s5 = inlined_call_operand.vmem [shape: f32[36,208], index: 5, kind: input, shape index: {}]   ;;  %s2896_s6 = inlined_call_operand.vmem [shape: bf16[2,36,128], index: 6, kind: output, shape index: {}]  }
   0x1   :  { %s2457_s23 = smov 0  }
   0x2 LB: > { %s28_s2 = sadd.s32 1, %s2412_s22  ;;  %p1973_p0 = scmp.ge.s32.totalorder %s2416_s23, 1  ;;  %s2416_s23 = sphi %s2457_s23, %s16_s23   ;;  %s2412_s22 = sphi %s2455_s22, %s2898_s22   ;;  %s2408_s21 = sphi %s2453_s21, %s2897_s21  }
   0x3   : > { %p30_p1 = scmp.ge.s32.totalorder %s28_s2, 2  ;;  %p259_p2 = scmp.lt.s32.totalorder %s2416_s23, 3 }
   0x5   : > { %s2900_s2 = smov (%p30_p1, %s28_s2), 0  ;;  %p260_p3 = pnand %p1973_p0, %p259_p2 }
   0x6   : > { %p305_p4 = scmp.lt.s32.totalorder (!%p260_p3), %s2408_s21, 1 }
   0x7   : > { %263 = sbr.rel (%p260_p3) target bundleno = 619 (0x26b), region = 44 }
   0xc   : > { %v2308_v0 = vld [vmem:[%s2891_s1 + $0x10] sm:$0xff]  ;;  %v2313_v1 = vld [vmem:[%s2891_s1 + $0x18] sm:$0xff]  ;;  %v2303_v2 = vld [vmem:[%s2891_s1 + $0x8] sm:$0xff]  ;;  %s2902_s21 = smov (!%p305_p4, %s2408_s21), 1  ;;  %vm373_vm0 = vcmask 130048  }
   0xd   : > { %v2301_v3 = vld [vmem:[%s2891_s1] sm:$0xff]  ;;  %514 = vmatpush.bf16.msra.mxu2 %v2308_v0  ;;  %600 = vmatpush.bf16.msra.mxu3 %v2313_v1  ;;  %s2296_s8 = sshll.u32 %s2902_s21, 7  ;;  %v2325_v8 = vld [vmem:[%s2891_s1 + $0x10] sm:$0xff]  ;;  %v2330_v9 = vld [vmem:[%s2891_s1 + $0x18] sm:$0xff]  ;;  %s2367_s18 = smul.u32 20, %s2902_s21 }
   0xe   : > { %393 = vmatpush.bf16.msra.mxu0 %v2303_v2  ;;  %436 = vmatpush.bf16.msra.mxu1 %v2301_v3  ;;  %s2489_s11 = scalar_lea.vmem %s2890_s0, %s2296_s8  ;;  %v2320_v16 = vld [vmem:[%s2891_s1 + $0x8] sm:$0xff]  ;;  %v2318_v17 = vld [vmem:[%s2891_s1] sm:$0xff]  ;;  %v2342_v25 = vld [vmem:[%s2891_s1 + $0x10] sm:$0xff] }
   0xf   : > { %v2304_v4 = vld [vmem:[%s2489_s11 + $0x10] sm:$0xff]  ;;  %v2309_v5 = vld [vmem:[%s2489_s11 + $0x18] sm:$0xff]  ;;  %v2298_v6 = vld [vmem:[%s2489_s11 + $0x8] sm:$0xff]  ;;  %s330_s24 = scalar_lea.vmem %s2896_s6, %s2367_s18 }
  0x10   : > { %v2297_v7 = vld [vmem:[%s2489_s11] sm:$0xff]  ;;  %2037 = vmatmul.msk.bf16.vlgmr.msra.gmra.mxu2 %vm373_vm0, %v2304_v4  ;;  %2063 = vmatmul.msk.bf16.vlgmr.msra.gmra.mxu3 %vm373_vm0, %v2309_v5  ;;  %v2305_v10 = vld [vmem:[%s2489_s11 + $0x18] sm:$0xff]  ;;  %v2299_v12 = vld [vmem:[%s2489_s11 + $0x10] sm:$0xff] }
  0x11   : > { %1999 = vmatmul.msk.bf16.vlgmr.msra.gmra.mxu0 %vm373_vm0, %v2298_v6  ;;  %2011 = vmatmul.msk.bf16.vlgmr.msra.gmra.mxu1 %vm373_vm0, %v2297_v7  ;;  %v2310_v11 = vld [vmem:[%s2489_s11 + $0x20] sm:$0xff]  ;;  %v2311_v14 = vld [vmem:[%s2489_s11 + $0x28] sm:$0xff]  ;;  %v2300_v15 = vld [vmem:[%s2489_s11 + $0x18] sm:$0xff] }
  0x12   : > { %853 = vmatpush.bf16.msrb.mxu2 %v2325_v8  ;;  %938 = vmatpush.bf16.msrb.mxu3 %v2330_v9  ;;  %v2306_v13 = vld [vmem:[%s2489_s11 + $0x20] sm:$0xff]  ;;  %v2307_v18 = vld [vmem:[%s2489_s11 + $0x28] sm:$0xff]  ;;  %v2312_v19 = vld [vmem:[%s2489_s11 + $0x30] sm:$0xff] }
  0x13   : > { %733 = vmatpush.bf16.msrb.mxu0 %v2320_v16  ;;  %776 = vmatpush.bf16.msrb.mxu1 %v2318_v17  ;;  %v2302_v20 = vld [vmem:[%s2489_s11 + $0x20] sm:$0xff]  ;;  %v2321_v21 = vld [vmem:[%s2489_s11 + $0x30] sm:$0xff]  ;;  %v2326_v22 = vld [vmem:[%s2489_s11 + $0x38] sm:$0xff] }
  0x14   : > { %v2315_v23 = vld [vmem:[%s2489_s11 + $0x28] sm:$0xff]  ;;  %v2314_v24 = vld [vmem:[%s2489_s11 + $0x20] sm:$0xff]  ;;  %v2347_v26 = vld [vmem:[%s2891_s1 + $0x18] sm:$0xff] }
  0x15   : > { %v2322_v27 = vld [vmem:[%s2489_s11 + $0x38] sm:$0xff]  ;;  %v2327_v28 = vld [vmem:[%s2489_s11 + $0x40] sm:$0xff]  ;;  %v2316_v29 = vld [vmem:[%s2489_s11 + $0x30] sm:$0xff] }
  0x16   : > { %1191 = vmatpush.bf16.msra.mxu2 %v2342_v25  ;;  %1276 = vmatpush.bf16.msra.mxu3 %v2347_v26  ;;  %v2323_v30 = vld [vmem:[%s2489_s11 + $0x40] sm:$0xff]  ;;  %v2328_v31 = vld [vmem:[%s2489_s11 + $0x48] sm:$0xff]  ;;  %v2317_v32 = vld [vmem:[%s2489_s11 + $0x38] sm:$0xff] }
  0x17   : > { %v2337_v33 = vld [vmem:[%s2891_s1 + $0x8] sm:$0xff]  ;;  %v2335_v34 = vld [vmem:[%s2891_s1] sm:$0xff]  ;;  %v2329_v36 = vld [vmem:[%s2489_s11 + $0x50] sm:$0xff] }
  0x18   : > { %1071 = vmatpush.bf16.msra.mxu0 %v2337_v33  ;;  %1114 = vmatpush.bf16.msra.mxu1 %v2335_v34  ;;  %v2324_v35 = vld [vmem:[%s2489_s11 + $0x48] sm:$0xff]  ;;  %v2319_v37 = vld [vmem:[%s2489_s11 + $0x40] sm:$0xff]  ;;  %v2338_v38 = vld [vmem:[%s2489_s11 + $0x50] sm:$0xff] }
  0x19   : > { %v2343_v39 = vld [vmem:[%s2489_s11 + $0x58] sm:$0xff]  ;;  %v2332_v40 = vld [vmem:[%s2489_s11 + $0x48] sm:$0xff]  ;;  %v2331_v41 = vld [vmem:[%s2489_s11 + $0x40] sm:$0xff] }
  0x1a   : > { %v2351_v45 = vld [vmem:[%s2891_s1 + $0x8] sm:$0xff]  ;;  %v2349_v53 = vld [vmem:[%s2891_s1] sm:$0xff]  ;;  %v2339_v57 = vld [vmem:[%s2489_s11 + $0x58] sm:$0xff] }
  0x1b   : > { %v2344_v58 = vld [vmem:[%s2489_s11 + $0x60] sm:$0xff]  ;;  %v2333_v59 = vld [vmem:[%s2489_s11 + $0x50] sm:$0xff] }
  0x1c   : > { %v2353_v26 = vld [vmem:[%s2891_s1 + $0x10] sm:$0xff] }
  0x20   : > { %2038 = vmatmul.msk.bf16.gmra.mxu2 %vm373_vm0, %v2305_v10  ;;  %2064 = vmatmul.msk.bf16.gmra.mxu3 %vm373_vm0, %v2310_v11  ;;  %v2340_v10 = vld [vmem:[%s2489_s11 + $0x60] sm:$0xff]  ;;  %v2345_v11 = vld [vmem:[%s2489_s11 + $0x68] sm:$0xff] }
  0x21   : > { %2000 = vmatmul.msk.bf16.gmra.mxu0 %vm373_vm0, %v2299_v12  ;;  %2012 = vmatmul.msk.bf16.gmra.mxu1 %vm373_vm0, %v2298_v6 }
  0x30   : > { %2039 = vmatmul.msk.bf16.gmra.mxu2 %vm373_vm0, %v2306_v13  ;;  %2065 = vmatmul.msk.bf16.gmra.mxu3 %vm373_vm0, %v2311_v14 }
  0x31   : > { %2001 = vmatmul.msk.bf16.gmra.mxu0 %vm373_vm0, %v2300_v15  ;;  %2013 = vmatmul.msk.bf16.gmra.mxu1 %vm373_vm0, %v2299_v12  ;;  %v2334_v12 = vld [vmem:[%s2489_s11 + $0x58] sm:$0xff] }
  0x40   : > { %2040 = vmatmul.msk.bf16.gmra.mxu2 %vm373_vm0, %v2307_v18  ;;  %2066 = vmatmul.msk.bf16.gmra.mxu3 %vm373_vm0, %v2312_v19 }
  0x41   : > { %2002 = vmatmul.msk.bf16.gmra.mxu0 %vm373_vm0, %v2302_v20  ;;  %2014 = vmatmul.msk.bf16.gmra.mxu1 %vm373_vm0, %v2300_v15 }
  0x50   : > { %2127 = vmatmul.msk.bf16.vlgmr.msrb.gmra.mxu2 %vm373_vm0, %v2321_v21  ;;  %2153 = vmatmul.msk.bf16.vlgmr.msrb.gmra.mxu3 %vm373_vm0, %v2326_v22 }
  0x51   : > { %2089 = vmatmul.msk.bf16.vlgmr.msrb.gmra.mxu0 %vm373_vm0, %v2315_v23  ;;  %2101 = vmatmul.msk.bf16.vlgmr.msrb.gmra.mxu1 %vm373_vm0, %v2314_v24 }
  0x52   : > { %1379 = vmatpush.bf16.msrb.mxu2 %v2351_v45  ;;  %1407 = vmatpush.bf16.msrb.mxu3 %v2349_v53 }
  0x60   : > { %2128 = vmatmul.msk.bf16.gmra.mxu2 %vm373_vm0, %v2322_v27  ;;  %2154 = vmatmul.msk.bf16.gmra.mxu3 %vm373_vm0, %v2327_v28  ;;  %v2355_v27 = vld [vmem:[%s2891_s1 + $0x18] sm:$0xff] }
  0x61   : > { %2090 = vmatmul.msk.bf16.gmra.mxu0 %vm373_vm0, %v2316_v29  ;;  %2102 = vmatmul.msk.bf16.gmra.mxu1 %vm373_vm0, %v2315_v23 }
  0x70   : > { %2129 = vmatmul.msk.bf16.gmra.mxu2 %vm373_vm0, %v2323_v30  ;;  %2155 = vmatmul.msk.bf16.gmra.mxu3 %vm373_vm0, %v2328_v31  ;;  %v2346_v30 = vld [vmem:[%s2489_s11 + $0x70] sm:$0xff]  ;;  %v2336_v31 = vld [vmem:[%s2489_s11 + $0x60] sm:$0xff] }
  0x71   : > { %2091 = vmatmul.msk.bf16.gmra.mxu0 %vm373_vm0, %v2317_v32  ;;  %2103 = vmatmul.msk.bf16.gmra.mxu1 %vm373_vm0, %v2316_v29  ;;  %v2341_v29 = vld [vmem:[%s2489_s11 + $0x68] sm:$0xff] }
  0x80   : > { %2130 = vmatmul.msk.bf16.gmra.mxu2 %vm373_vm0, %v2324_v35  ;;  %2156 = vmatmul.msk.bf16.gmra.mxu3 %vm373_vm0, %v2329_v36 }
  0x81   : > { %2092 = vmatmul.msk.bf16.gmra.mxu0 %vm373_vm0, %v2319_v37  ;;  %2104 = vmatmul.msk.bf16.gmra.mxu1 %vm373_vm0, %v2317_v32 }
  0x8e   : > { %v395_v42 = vpop.f32.mrf.mxu0  ;;  %v438_v43 = vpop.f32.mrf.mxu1 }
  0x8f   : > { %v439_v44 = vadd.f32 %v438_v43, %v395_v42 }
  0x90   : > { %2217 = vmatmul.msk.bf16.vlgmr.msra.gmra.mxu2 %vm373_vm0, %v2338_v38  ;;  %2243 = vmatmul.msk.bf16.vlgmr.msra.gmra.mxu3 %vm373_vm0, %v2343_v39 }
  0x91   : > { %2179 = vmatmul.msk.bf16.vlgmr.msra.gmra.mxu0 %vm373_vm0, %v2332_v40  ;;  %2191 = vmatmul.msk.bf16.vlgmr.msra.gmra.mxu1 %vm373_vm0, %v2331_v41 }
  0x92   : > { %1439 = vmatpush.bf16.msra.mxu2 %v2353_v26  ;;  %1473 = vmatpush.bf16.msra.mxu3 %v2355_v27 }
  0x93   : > { %v516_v46 = vpop.f32.mrf.mxu2  ;;  %v602_v47 = vpop.f32.mrf.mxu3 }
  0x94   : > { %v536_v48 = vadd.f32 %v516_v46, %v439_v44  ;;  %v2350_v46 = vld [vmem:[%s2489_s11 + $0x68] sm:$0xff] }
  0x96   : > { %v2584_v49 = vadd.f32 %v602_v47, %v536_v48  ;;  %v397_v50 = vpop.f32.mrf.mxu0  ;;  %v440_v51 = vpop.f32.mrf.mxu1  ;;  %v2348_v47 = vld [vmem:[%s2489_s11 + $0x60] sm:$0xff] }
  0x97   : > { %v441_v52 = vadd.f32 %v440_v51, %v397_v50 }
  0x9b   : > { %v518_v54 = vpop.f32.mrf.mxu2  ;;  %v604_v55 = vpop.f32.mrf.mxu3 }
  0x9c   : > { %v537_v56 = vadd.f32 %v518_v54, %v441_v52 }
  0x9e   : > { %v2592_v60 = vadd.f32 %v604_v55, %v537_v56  ;;  %v400_v61 = vpop.f32.mrf.mxu0  ;;  %v443_v62 = vpop.f32.mrf.mxu1 }
  0x9f   : > { %v444_v63 = vadd.f32 %v443_v62, %v400_v61 }
  0xa0   : > { %2218 = vmatmul.msk.bf16.gmra.mxu2 %vm373_vm0, %v2339_v57  ;;  %2244 = vmatmul.msk.bf16.gmra.mxu3 %vm373_vm0, %v2344_v58 }
  0xa1   : > { %2180 = vmatmul.msk.bf16.gmra.mxu0 %vm373_vm0, %v2333_v59  ;;  %2192 = vmatmul.msk.bf16.gmra.mxu1 %vm373_vm0, %v2332_v40 }
  0xa3   : > { %v521_v0 = vpop.f32.mrf.mxu2  ;;  %v607_v1 = vpop.f32.mrf.mxu3 }
  0xa4   : > { %v538_v2 = vadd.f32 %v521_v0, %v444_v63  ;;  %v2352_v0 = vld [vmem:[%s2489_s11 + $0x70] sm:$0xff] }
  0xa6   : > { %v2598_v3 = vadd.f32 %v607_v1, %v538_v2  ;;  %v402_v4 = vpop.f32.mrf.mxu0  ;;  %v445_v5 = vpop.f32.mrf.mxu1  ;;  %v2354_v1 = vld [vmem:[%s2489_s11 + $0x78] sm:$0xff] }
  0xa7   : > { %v446_v6 = vadd.f32 %v445_v5, %v402_v4 }
  0xab   : > { %v523_v7 = vpop.f32.mrf.mxu2  ;;  %v609_v8 = vpop.f32.mrf.mxu3 }
  0xac   : > { %v539_v9 = vadd.f32 %v523_v7, %v446_v6 }
  0xae   : > { %v2603_v13 = vadd.f32 %v609_v8, %v539_v9  ;;  %v405_v14 = vpop.f32.mrf.mxu0  ;;  %v448_v15 = vpop.f32.mrf.mxu1 }
  0xaf   : > { %v449_v16 = vadd.f32 %v448_v15, %v405_v14 }
  0xb0   : > { %2219 = vmatmul.msk.bf16.gmra.mxu2 %vm373_vm0, %v2340_v10  ;;  %2245 = vmatmul.msk.bf16.gmra.mxu3 %vm373_vm0, %v2345_v11 }
  0xb1   : > { %2181 = vmatmul.msk.bf16.gmra.mxu0 %vm373_vm0, %v2334_v12  ;;  %2193 = vmatmul.msk.bf16.gmra.mxu1 %vm373_vm0, %v2333_v59 }
  0xb3   : > { %v526_v17 = vpop.f32.mrf.mxu2  ;;  %v612_v18 = vpop.f32.mrf.mxu3 }
  0xb4   : > { %v540_v19 = vadd.f32 %v526_v17, %v449_v16 }
  0xb6   : > { %v2609_v20 = vadd.f32 %v612_v18, %v540_v19  ;;  %v407_v21 = vpop.f32.mrf.mxu0  ;;  %v450_v22 = vpop.f32.mrf.mxu1 }
  0xb7   : > { %v451_v23 = vadd.f32 %v450_v22, %v407_v21 }
  0xbb   : > { %v528_v24 = vpop.f32.mrf.mxu2  ;;  %v614_v25 = vpop.f32.mrf.mxu3 }
  0xbc   : > { %v541_v28 = vadd.f32 %v528_v24, %v451_v23 }
  0xbe   : > { %v2620_v32 = vadd.f32 %v614_v25, %v541_v28  ;;  %v410_v33 = vpop.f32.mrf.mxu0  ;;  %v453_v34 = vpop.f32.mrf.mxu1 }
  0xbf   : > { %v454_v35 = vadd.f32 %v453_v34, %v410_v33 }
  0xc0   : > { %2220 = vmatmul.msk.bf16.gmra.mxu2 %vm373_vm0, %v2341_v29  ;;  %2246 = vmatmul.msk.bf16.gmra.mxu3 %vm373_vm0, %v2346_v30 }
  0xc1   : > { %2182 = vmatmul.msk.bf16.gmra.mxu0 %vm373_vm0, %v2336_v31  ;;  %2194 = vmatmul.msk.bf16.gmra.mxu1 %vm373_vm0, %v2334_v12 }
  0xc3   : > { %v531_v36 = vpop.f32.mrf.mxu2  ;;  %v617_v37 = vpop.f32.mrf.mxu3 }
  0xc4   : > { %v542_v38 = vadd.f32 %v531_v36, %v454_v35 }
  0xc6   : > { %v2626_v39 = vadd.f32 %v617_v37, %v542_v38  ;;  %v412_v40 = vpop.f32.mrf.mxu0  ;;  %v455_v41 = vpop.f32.mrf.mxu1 }
  0xc7   : > { %v456_v42 = vadd.f32 %v455_v41, %v412_v40 }
  0xcb   : > { %v533_v43 = vpop.f32.mrf.mxu2  ;;  %v619_v44 = vpop.f32.mrf.mxu3 }
  0xcc   : > { %v543_v45 = vadd.f32 %v533_v43, %v456_v42 }
  0xce   : > { %v2630_v48 = vadd.f32 %v619_v44, %v543_v45  ;;  %v735_v50 = vpop.f32.mrf.mxu0  ;;  %v778_v51 = vpop.f32.mrf.mxu1 }
  0xcf   : > { %v779_v52 = vadd.f32 %v778_v51, %v735_v50 }
  0xd0   : > { %2257 = vmatmul.msk.bf16.vlgmr.msrb.gmra.mxu2 %vm373_vm0, %v2350_v46  ;;  %2266 = vmatmul.msk.bf16.vlgmr.msrb.gmra.mxu3 %vm373_vm0, %v2348_v47 }
  0xd3   : > { %v855_v53 = vpop.f32.mrf.mxu2  ;;  %v940_v54 = vpop.f32.mrf.mxu3 }
  0xd4   : > { %v875_v55 = vadd.f32 %v855_v53, %v779_v52 }
  0xd6   : > { %v2634_v56 = vadd.f32 %v940_v54, %v875_v55  ;;  %v737_v57 = vpop.f32.mrf.mxu0  ;;  %v780_v58 = vpop.f32.mrf.mxu1 }
  0xd7   : > { %v781_v59 = vadd.f32 %v780_v58, %v737_v57 }
  0xd8   : > { %v990_v31 = vmul.f32 %v2634_v56, %v2634_v56 }
  0xdb   : > { %v857_v61 = vpop.f32.mrf.mxu2  ;;  %v942_v62 = vpop.f32.mrf.mxu3 }
  0xdc   : > { %v876_v63 = vadd.f32 %v857_v61, %v781_v59 }
  0xde   : > { %v2638_v2 = vadd.f32 %v942_v62, %v876_v63  ;;  %v740_v4 = vpop.f32.mrf.mxu0  ;;  %v783_v5 = vpop.f32.mrf.mxu1 }
  0xdf   : > { %v784_v6 = vadd.f32 %v783_v5, %v740_v4 }
  0xe0   : > { %2277 = vmatmul.msk.bf16.vlgmr.msra.gmra.mxu2 %vm373_vm0, %v2352_v0  ;;  %2288 = vmatmul.msk.bf16.vlgmr.msra.gmra.mxu3 %vm373_vm0, %v2354_v1  ;;  %v991_v26 = vmul.f32 %v2638_v2, %v2638_v2  ;;  %v976_v33 = vadd.f32 %v2638_v2, %v2634_v56 }
  0xe2   : > { %v998_v35 = vadd.f32 %v991_v26, %v990_v31 }
  0xe3   : > { %v860_v7 = vpop.f32.mrf.mxu2  ;;  %v945_v8 = vpop.f32.mrf.mxu3 }
  0xe4   : > { %v877_v9 = vadd.f32 %v860_v7, %v784_v6 }
  0xe6   : > { %v2642_v10 = vadd.f32 %v945_v8, %v877_v9  ;;  %v742_v11 = vpop.f32.mrf.mxu0  ;;  %v785_v12 = vpop.f32.mrf.mxu1 }
  0xe7   : > { %v786_v14 = vadd.f32 %v785_v12, %v742_v11 }
  0xe8   : > { %v992_v34 = vmul.f32 %v2642_v10, %v2642_v10  ;;  %v977_v36 = vadd.f32 %v976_v33, %v2642_v10 }
  0xea   : > { %v999_v41 = vadd.f32 %v998_v35, %v992_v34 }
  0xeb   : > { %v862_v15 = vpop.f32.mrf.mxu2  ;;  %v947_v16 = vpop.f32.mrf.mxu3 }
  0xec   : > { %v878_v17 = vadd.f32 %v862_v15, %v786_v14 }
  0xee   : > { %v2644_v18 = vadd.f32 %v947_v16, %v878_v17  ;;  %v745_v19 = vpop.f32.mrf.mxu0  ;;  %v788_v21 = vpop.f32.mrf.mxu1 }
  0xef   : > { %v789_v22 = vadd.f32 %v788_v21, %v745_v19 }
  0xf0   : > { %v993_v37 = vmul.f32 %v2644_v18, %v2644_v18  ;;  %v978_v42 = vadd.f32 %v977_v36, %v2644_v18 }
  0xf2   : > { %v1000_v45 = vadd.f32 %v999_v41, %v993_v37 }
  0xf3   : > { %v865_v23 = vpop.f32.mrf.mxu2  ;;  %v950_v24 = vpop.f32.mrf.mxu3 }
  0xf4   : > { %v879_v25 = vadd.f32 %v865_v23, %v789_v22 }
  0xf6   : > { %v2648_v27 = vadd.f32 %v950_v24, %v879_v25  ;;  %v747_v28 = vpop.f32.mrf.mxu0  ;;  %v790_v29 = vpop.f32.mrf.mxu1 }
  0xf7   : > { %v791_v30 = vadd.f32 %v790_v29, %v747_v28 }
  0xf8   : > { %v994_v43 = vmul.f32 %v2648_v27, %v2648_v27  ;;  %v979_v46 = vadd.f32 %v978_v42, %v2648_v27 }
  0xfa   : > { %v1001_v53 = vadd.f32 %v1000_v45, %v994_v43 }
  0xfb   : > { %v867_v38 = vpop.f32.mrf.mxu2  ;;  %v952_v40 = vpop.f32.mrf.mxu3 }
  0xfc   : > { %v880_v44 = vadd.f32 %v867_v38, %v791_v30 }
  0xfe   : > { %v2663_v47 = vadd.f32 %v952_v40, %v880_v44  ;;  %v750_v50 = vpop.f32.mrf.mxu0  ;;  %v793_v51 = vpop.f32.mrf.mxu1 }
  0xff   : > { %v794_v52 = vadd.f32 %v793_v51, %v750_v50 }
 0x100   : > { %v980_v54 = vadd.f32 %v979_v46, %v2663_v47  ;;  %v995_v55 = vmul.f32 %v2663_v47, %v2663_v47 }
 0x102   : > { %v1002_v57 = vadd.f32 %v1001_v53, %v995_v55 }
 0x103   : > { %v870_v58 = vpop.f32.mrf.mxu2  ;;  %v955_v59 = vpop.f32.mrf.mxu3 }
 0x104   : > { %v881_v61 = vadd.f32 %v870_v58, %v794_v52 }
 0x106   : > { %v2668_v62 = vadd.f32 %v955_v59, %v881_v61  ;;  %v752_v63 = vpop.f32.mrf.mxu0  ;;  %v795_v0 = vpop.f32.mrf.mxu1 }
 0x107   : > { %v796_v5 = vadd.f32 %v795_v0, %v752_v63 }
 0x108   : > { %v981_v1 = vadd.f32 %v980_v54, %v2668_v62  ;;  %v996_v4 = vmul.f32 %v2668_v62, %v2668_v62 }
 0x10a   : > { %v1003_v6 = vadd.f32 %v1002_v57, %v996_v4 }
 0x10b   : > { %v872_v7 = vpop.f32.mrf.mxu2  ;;  %v957_v8 = vpop.f32.mrf.mxu3 }
 0x10c   : > { %v882_v9 = vadd.f32 %v872_v7, %v796_v5 }
 0x10e   : > { %v2673_v11 = vadd.f32 %v957_v8, %v882_v9  ;;  %v1073_v12 = vpop.f32.mrf.mxu0  ;;  %v1116_v14 = vpop.f32.mrf.mxu1 }
 0x10f   : > { %v1117_v17 = vadd.f32 %v1116_v14, %v1073_v12 }
 0x110   : > { %v2676_v15 = vadd.f32 %v981_v1, %v2673_v11  ;;  %v997_v16 = vmul.f32 %v2673_v11, %v2673_v11 }
 0x112   : > { %v2680_v19 = vadd.f32 %v1003_v6, %v997_v16  ;;  %v653_v16 = vmul.f32 %v2592_v60, %v2592_v60 }
 0x113   : > { %v1193_v21 = vpop.f32.mrf.mxu2  ;;  %v1278_v22 = vpop.f32.mrf.mxu3 }
 0x114   : > { %v1213_v23 = vadd.f32 %v1193_v21, %v1117_v17 }
 0x116   : > { %v2682_v24 = vadd.f32 %v1278_v22, %v1213_v23  ;;  %v1075_v25 = vpop.f32.mrf.mxu0  ;;  %v1118_v26 = vpop.f32.mrf.mxu1 }
 0x117   : > { %v1119_v28 = vadd.f32 %v1118_v26, %v1075_v25  ;;  %v652_v25 = vmul.f32 %v2584_v49, %v2584_v49  ;;  %v638_v26 = vadd.f32 %v2592_v60, %v2584_v49 }
 0x11b   : > { %v1195_v29 = vpop.f32.mrf.mxu2  ;;  %v1280_v30 = vpop.f32.mrf.mxu3 }
 0x11c   : > { %v1214_v31 = vadd.f32 %v1195_v29, %v1119_v28  ;;  %v654_v28 = vmul.f32 %v2598_v3, %v2598_v3  ;;  %v1328_v29 = vmul.f32 %v2682_v24, %v2682_v24 }
 0x11e   : > { %v2684_v33 = vadd.f32 %v1280_v30, %v1214_v31  ;;  %v1078_v34 = vpop.f32.mrf.mxu0  ;;  %v1121_v35 = vpop.f32.mrf.mxu1 }
 0x11f   : > { %v1122_v59 = vadd.f32 %v1121_v35, %v1078_v34 }
 0x120   : > { %v1329_v17 = vmul.f32 %v2684_v33, %v2684_v33  ;;  %v1314_v34 = vadd.f32 %v2684_v33, %v2682_v24 }
 0x123   : > { %v1198_v36 = vpop.f32.mrf.mxu2  ;;  %v1283_v37 = vpop.f32.mrf.mxu3 }
 0x124   : > { %v1215_v1 = vadd.f32 %v1198_v36, %v1122_v59 }
 0x126   : > { %v1080_v38 = vpop.f32.mrf.mxu0  ;;  %v1123_v40 = vpop.f32.mrf.mxu1  ;;  %v2686_v9 = vadd.f32 %v1283_v37, %v1215_v1 }
 0x127   : > { %v1124_v61 = vadd.f32 %v1123_v40, %v1080_v38  ;;  %v660_v38 = vadd.f32 %v653_v16, %v652_v25  ;;  %v639_v40 = vadd.f32 %v638_v26, %v2598_v3 }
 0x128   : > { %v1330_v35 = vmul.f32 %v2686_v9, %v2686_v9 }
 0x12b   : > { %v1200_v41 = vpop.f32.mrf.mxu2  ;;  %v1285_v42 = vpop.f32.mrf.mxu3 }
 0x12c   : > { %v1216_v5 = vadd.f32 %v1200_v41, %v1124_v61  ;;  %v655_v41 = vmul.f32 %v2603_v13, %v2603_v13 }
 0x12e   : > { %v1083_v43 = vpop.f32.mrf.mxu0  ;;  %v1126_v44 = vpop.f32.mrf.mxu1  ;;  %v2692_v21 = vadd.f32 %v1285_v42, %v1216_v5  ;;  %v1336_v42 = vadd.f32 %v1329_v17, %v1328_v29 }
 0x12f   : > { %v1127_v4 = vadd.f32 %v1126_v44, %v1083_v43  ;;  %v1315_v43 = vadd.f32 %v1314_v34, %v2686_v9 }
 0x130   : > { %v1331_v44 = vmul.f32 %v2692_v21, %v2692_v21 }
 0x133   : > { %v1203_v45 = vpop.f32.mrf.mxu2  ;;  %v1288_v46 = vpop.f32.mrf.mxu3 }
 0x134   : > { %v1217_v12 = vadd.f32 %v1203_v45, %v1127_v4 }
 0x136   : > { %v1085_v50 = vpop.f32.mrf.mxu0  ;;  %v1128_v51 = vpop.f32.mrf.mxu1  ;;  %v2706_v36 = vadd.f32 %v1288_v46, %v1217_v12  ;;  %v640_v46 = vadd.f32 %v639_v40, %v2603_v13 }
 0x137   : > { %v1129_v6 = vadd.f32 %v1128_v51, %v1085_v50  ;;  %v661_v51 = vadd.f32 %v660_v38, %v654_v28 }
 0x138   : > { %v641_v1 = vadd.f32 %v640_v46, %v2609_v20 }
 0x139   : > { %v662_v61 = vadd.f32 %v661_v51, %v655_v41  ;;  %v983_v41 = vrot.slane %v2676_v15, 4 }
 0x13b   : > { %v1205_v52 = vpop.f32.mrf.mxu2  ;;  %v1290_v53 = vpop.f32.mrf.mxu3 }
 0x13c   : > { %v1218_v22 = vadd.f32 %v1205_v52, %v1129_v6  ;;  %v656_v52 = vmul.f32 %v2609_v20, %v2609_v20 }
 0x13e   : > { %v1088_v57 = vpop.f32.mrf.mxu0  ;;  %v1131_v58 = vpop.f32.mrf.mxu1  ;;  %v2714_v45 = vadd.f32 %v1290_v53, %v1218_v22  ;;  %v657_v53 = vmul.f32 %v2620_v32, %v2620_v32 }
 0x13f   : > { %v1132_v14 = vadd.f32 %v1131_v58, %v1088_v57  ;;  %v1316_v57 = vadd.f32 %v1315_v43, %v2692_v21  ;;  %v1332_v58 = vmul.f32 %v2706_v36, %v2706_v36 }
 0x140   : > { %v1333_v5 = vmul.f32 %v2714_v45, %v2714_v45 }
 0x141   : > { %v1317_v4 = vadd.f32 %v1316_v57, %v2706_v36 }
 0x143   : > { %v1208_v54 = vpop.f32.mrf.mxu2  ;;  %v1293_v55 = vpop.f32.mrf.mxu3  ;;  %v1318_v17 = vadd.f32 %v1317_v4, %v2714_v45 }
 0x144   : > { %v1219_v37 = vadd.f32 %v1208_v54, %v1132_v14  ;;  %v1337_v54 = vadd.f32 %v1336_v42, %v1330_v35 }
 0x146   : > { %v1090_v7 = vpop.f32.mrf.mxu0  ;;  %v1133_v8 = vpop.f32.mrf.mxu1  ;;  %v2722_v59 = vadd.f32 %v1293_v55, %v1219_v37  ;;  %v658_v55 = vmul.f32 %v2626_v39, %v2626_v39 }
 0x147   : > { %v1134_v23 = vadd.f32 %v1133_v8, %v1090_v7  ;;  %v663_v7 = vadd.f32 %v662_v61, %v656_v52  ;;  %v642_v8 = vadd.f32 %v641_v1, %v2620_v32 }
 0x148   : > { %v1334_v22 = vmul.f32 %v2722_v59, %v2722_v59  ;;  %v1319_v28 = vadd.f32 %v1318_v17, %v2722_v59 }
 0x149   : > { %v643_v25 = vadd.f32 %v642_v8, %v2626_v39 }
 0x14b   : > { %v1210_v63 = vpop.f32.mrf.mxu2  ;;  %v1295_v0 = vpop.f32.mrf.mxu3  ;;  %v644_v35 = vadd.f32 %v643_v25, %v2630_v48 }
 0x14c   : > { %v1220_v50 = vadd.f32 %v1210_v63, %v1134_v23  ;;  %v1338_v63 = vadd.f32 %v1337_v54, %v1331_v44  ;;  %v664_v23 = vadd.f32 %v663_v7, %v657_v53  ;;  %v1005_v44 = vrot.slane %v2680_v19, 4 }
 0x14d   : > { %v645_v43 = vrot.slane %v644_v35, 4  ;;  %v984_v54 = vadd.f32 %v983_v41, %v2676_v15 }
 0x14e   : > { %v2730_v6 = vadd.f32 %v1295_v0, %v1220_v50  ;;  %v1339_v16 = vadd.f32 %v1338_v63, %v1332_v58  ;;  %v659_v0 = vmul.f32 %v2630_v48, %v2630_v48  ;;  %v665_v34 = vadd.f32 %v664_v23, %v658_v55 }
 0x14f   : > { %v646_v61 = vadd.f32 %v645_v43, %v644_v35  ;;  %v1006_v1 = vadd.f32 %v1005_v44, %v2680_v19 }
 0x150   : > { %v1340_v26 = vadd.f32 %v1339_v16, %v1333_v5  ;;  %v1335_v29 = vmul.f32 %v2730_v6, %v2730_v6  ;;  %v1320_v38 = vadd.f32 %v1319_v28, %v2730_v6  ;;  %v666_v40 = vadd.f32 %v665_v34, %v659_v0 }
 0x151   : > { %v985_v5 = vrot.slane %v984_v54, 2  ;;  %v647_v55 = vrot.slane %v646_v61, 2  ;;  %v1007_v16 = vrot.slane %v1006_v1, 2 }
 0x152   : > { %v1341_v37 = vadd.f32 %v1340_v26, %v1334_v22  ;;  %v1321_v46 = vrot.slane %v1320_v38, 4  ;;  %v667_v52 = vrot.slane %v666_v40, 4 }
 0x153   : > { %v1381_v30 = vpop.f32.mrf.mxu2  ;;  %v1409_v31 = vpop.f32.mrf.mxu3  ;;  %v986_v26 = vadd.f32 %v985_v5, %v984_v54  ;;  %v648_v28 = vadd.f32 %v647_v55, %v646_v61  ;;  %v1008_v19 = vadd.f32 %v1007_v16, %v1006_v1 }
 0x154   : > { %v1342_v42 = vadd.f32 %v1341_v37, %v1335_v29  ;;  %v1410_v58 = vadd.f32 %v1409_v31, %v1381_v30  ;;  %v1322_v53 = vadd.f32 %v1321_v46, %v1320_v38  ;;  %v668_v4 = vadd.f32 %v667_v52, %v666_v40 }
 0x155   : > { %v987_v37 = vrot.slane %v986_v26, 1  ;;  %v1009_v43 = vrot.slane %v1008_v19, 1 }
 0x156   : > { %v1343_v57 = vrot.slane %v1342_v42, 4  ;;  %v1323_v22 = vrot.slane %v1322_v53, 2  ;;  %v669_v0 = vrot.slane %v668_v4, 2 }
 0x157   : > { %v988_v52 = vadd.f32 %v987_v37, %v986_v26  ;;  %v1010_v1 = vadd.f32 %v1009_v43, %v1008_v19 }
 0x158   : > { %v1344_v7 = vadd.f32 %v1343_v57, %v1342_v42  ;;  %v1324_v29 = vadd.f32 %v1323_v22, %v1322_v53  ;;  %v670_v35 = vadd.f32 %v669_v0, %v668_v4  ;;  %v649_v42 = vrot.slane %v648_v28, 1 }
 0x15a   : > { %v1345_v30 = vrot.slane %v1344_v7, 2  ;;  %v1325_v44 = vrot.slane %v1324_v29, 1  ;;  %v671_v46 = vrot.slane %v670_v35, 1  ;;  %v650_v61 = vadd.f32 %v649_v42, %v648_v28  ;;  %v1506_v42 = vld [vmem:[%s2893_s3] sm:$0x1] }
 0x15b   : > { %v1383_v12 = vpop.f32.mrf.mxu2  ;;  %v1411_v14 = vpop.f32.mrf.mxu3 }
 0x15c   : > { %v1412_v8 = vadd.f32 %v1411_v14, %v1383_v12  ;;  %v1346_v38 = vadd.f32 %v1345_v30, %v1344_v7  ;;  %v1326_v53 = vadd.f32 %v1325_v44, %v1324_v29  ;;  %v672_v4 = vadd.f32 %v671_v46, %v670_v35 }
 0x15e   : > { %v1347_v54 = vrot.slane %v1346_v38, 1 }
 0x160   : > { %v1348_v7 = vadd.f32 %v1347_v54, %v1346_v38 }
 0x163   : > { %v1441_v50 = vpop.f32.mrf.mxu2  ;;  %v1475_v51 = vpop.f32.mrf.mxu3 }
 0x164   : > { %v1446_v63 = vadd.f32 %v1441_v50, %v1410_v58 }
 0x166   : > { %v2750_v23 = vadd.f32 %v1475_v51, %v1446_v63 }
 0x168   : > { %v1492_v34 = vmul.f32 %v2750_v23, %v2750_v23 }
 0x16b   : > { %v1443_v17 = vpop.f32.mrf.mxu2  ;;  %v1477_v15 = vpop.f32.mrf.mxu3 }
 0x16c   : > { %v1447_v25 = vadd.f32 %v1443_v17, %v1412_v8  ;;  %v989_v8 = vadd.f32 %v988_v52, %v650_v61  ;;  %v1011_v17 = vadd.f32 %v1010_v1, %v672_v4 }
 0x16e   : > { %v1481_v31 = vadd.f32 %v1477_v15, %v1447_v25  ;;  %v1327_v22 = vadd.f32 %v1326_v53, %v989_v8  ;;  %v1349_v15 = vadd.f32 %v1348_v7, %v1011_v17 }
 0x170   : > { %v1484_v12 = vadd.f32 %v1481_v31, %v2750_v23  ;;  %v1493_v14 = vmul.f32 %v1481_v31, %v1481_v31 }
 0x172   : > { %v1485_v40 = vrot.slane %v1484_v12, 4  ;;  %v1494_v41 = vadd.f32 %v1493_v14, %v1492_v34 }
 0x174   : > { %v1486_v50 = vadd.f32 %v1485_v40, %v1484_v12  ;;  %v1495_v51 = vrot.slane %v1494_v41, 4 }
 0x176   : > { %v1487_v57 = vrot.slane %v1486_v50, 2  ;;  %v1496_v58 = vadd.f32 %v1495_v51, %v1494_v41  ;;  %v1519_v51 = vld [vmem:[%s2894_s4] sm:$0x1] }
 0x178   : > { %v1488_v63 = vadd.f32 %v1487_v57, %v1486_v50  ;;  %v1497_v5 = vrot.slane %v1496_v58, 2 }
 0x17a   : > { %v1489_v55 = vrot.slane %v1488_v63, 1  ;;  %v1498_v16 = vadd.f32 %v1497_v5, %v1496_v58 }
 0x17c   : > { %v1490_v25 = vadd.f32 %v1489_v55, %v1488_v63  ;;  %v1499_v0 = vrot.slane %v1498_v16, 1 }
 0x17e   : > { %v1491_v30 = vadd.f32 %v1490_v25, %v1327_v22  ;;  %v1500_v26 = vadd.f32 %v1499_v0, %v1498_v16 }
 0x180   : > { %v1501_v34 = vadd.f32 %v1500_v26, %v1349_v15  ;;  %v1502_v12 = vmul.f32 0.00591716, %v1491_v30 }
 0x182   : > { %v1503_v14 = vmul.f32 0.00591716, %v1501_v34  ;;  %v1504_v28 = vmul.f32 %v1502_v12, %v1502_v12 }
 0x184   : > { %v1505_v19 = vsub.f32 %v1503_v14, %v1504_v28 }
 0x186   : > { %v1507_v29 = vadd.f32 1e-05, %v1505_v19 }
 0x188   : > { %2392 = vrsqrt.f32 %v1507_v29  ;;  %vm1514_vm2 = vweird.f32 %v1507_v29 }
 0x18e   : > { %v2393_v37 = vpop.eup %2392 }
 0x18f   : > { %v1509_v35 = vmul.f32 %v2393_v37, %v1507_v29  ;;  %vm1515_vm1 = vweird.f32 %v2393_v37 }
 0x190   : > { %vm1516_vm3 = vmor %vm1514_vm2, %vm1515_vm1 }
 0x191   : > { %v1510_v40 = vmul.f32 %v2393_v37, %v1509_v35 }
 0x193   : > { %v1511_v38 = vmul.f32 0.5, %v1510_v40 }
 0x195   : > { %v1512_v41 = vsub.f32 1.5, %v1511_v38 }
 0x197   : > { %v1513_v43 = vmul.f32 %v2393_v37, %v1512_v41 }
 0x199   : > { %v1517_v44 = vsel %vm1516_vm3, %v2393_v37, %v1513_v43 }
 0x19a   : > { %v1518_v50 = vmul.f32 %v1517_v44, %v1506_v42 }
 0x19c   : > { %v1520_v46 = vmul.f32 %v1518_v50, %v1502_v12  ;;  %v2761_v52 = vperm.slane %v1518_v50, 0 }
 0x19e   : > { %v1521_v54 = vsub.f32 %v1519_v51, %v1520_v46  ;;  %v1699_v57 = vmul.f32 %v2761_v52, %v1481_v31  ;;  %v1599_v58 = vmul.f32 %v2761_v52, %v2673_v11  ;;  %v1598_v61 = vmul.f32 %v2761_v52, %v2668_v62 }
 0x19f   : > { %v1698_v1 = vmul.f32 %v2761_v52, %v2750_v23  ;;  %v1597_v53 = vmul.f32 %v2761_v52, %v2663_v47  ;;  %v1655_v63 = vmul.f32 %v2761_v52, %v2730_v6  ;;  %v1596_v5 = vmul.f32 %v2761_v52, %v2648_v27 }
 0x1a0   : > { %v2776_v4 = vperm.slane %v1521_v54, 0  ;;  %v1654_v11 = vmul.f32 %v2761_v52, %v2722_v59  ;;  %v1595_v62 = vmul.f32 %v2761_v52, %v2644_v18  ;;  %v1653_v23 = vmul.f32 %v2761_v52, %v2714_v45 }
 0x1a1   : > { %v1594_v47 = vmul.f32 %v2761_v52, %v2642_v10  ;;  %v1652_v6 = vmul.f32 %v2761_v52, %v2706_v36  ;;  %v1593_v27 = vmul.f32 %v2761_v52, %v2638_v2  ;;  %v1651_v31 = vmul.f32 %v2761_v52, %v2692_v21 }
 0x1a2   : > { %v1701_v59 = vadd.f32 %v1699_v57, %v2776_v4  ;;  %v1607_v8 = vadd.f32 %v1599_v58, %v2776_v4  ;;  %v1606_v18 = vadd.f32 %v1598_v61, %v2776_v4  ;;  %v1700_v45 = vadd.f32 %v1698_v1, %v2776_v4 }
 0x1a3   : > { %v1605_v7 = vadd.f32 %v1597_v53, %v2776_v4  ;;  %v1663_v10 = vadd.f32 %v1655_v63, %v2776_v4  ;;  %v1604_v36 = vadd.f32 %v1596_v5, %v2776_v4  ;;  %v1662_v55 = vadd.f32 %v1654_v11, %v2776_v4 }
 0x1a4   : > { %vm1615_vm4 = vcmp.ge.f32.partialorder %v1607_v8, 0.0  ;;  %v1623_v2 = vmul.f32 0.2, %v1607_v8  ;;  %vm1703_vm5 = vcmp.ge.f32.partialorder %v1701_v59, 0.0  ;;  %v1705_v21 = vmul.f32 0.2, %v1701_v59 }
 0x1a5   : > { %vm1614_vm6 = vcmp.ge.f32.partialorder %v1606_v18, 0.0  ;;  %v1622_v16 = vmul.f32 0.2, %v1606_v18  ;;  %vm1702_vm7 = vcmp.ge.f32.partialorder %v1700_v45, 0.0  ;;  %v1704_v17 = vmul.f32 0.2, %v1700_v45 }
 0x1a6   : > { %v1631_v22 = vsel %vm1615_vm4, %v1607_v8, %v1623_v2  ;;  %v1707_v25 = vsel %vm1703_vm5, %v1701_v59, %v1705_v21  ;;  %vm1613_vm8 = vcmp.ge.f32.partialorder %v1605_v7, 0.0  ;;  %v1621_v0 = vmul.f32 0.2, %v1605_v7 }
 0x1a7   : > { %1762 = vmatpush.msrb.mxu0 %v1631_v22  ;;  %1800 = vmatpush.msrb.mxu1 %v1707_v25  ;;  %v1630_v15 = vsel %vm1614_vm6, %v1606_v18, %v1622_v16  ;;  %v1706_v30 = vsel %vm1702_vm7, %v1700_v45, %v1704_v17  ;;  %vm1671_vm9 = vcmp.ge.f32.partialorder %v1663_v10, 0.0  ;;  %v1679_v26 = vmul.f32 0.2, %v1663_v10 }
 0x1a8   : > { %v1629_v34 = vsel %vm1613_vm8, %v1605_v7, %v1621_v0  ;;  %vm1612_vm10 = vcmp.ge.f32.partialorder %v1604_v36, 0.0  ;;  %v1620_v12 = vmul.f32 0.2, %v1604_v36  ;;  %vm1670_vm11 = vcmp.ge.f32.partialorder %v1662_v55, 0.0 }
 0x1a9   : > { %1763 = vmatpush.msrb.mxu0 %v1630_v15  ;;  %1801 = vmatpush.msrb.mxu1 %v1706_v30  ;;  %v1687_v14 = vsel %vm1671_vm9, %v1663_v10, %v1679_v26  ;;  %v1678_v28 = vmul.f32 0.2, %v1662_v55  ;;  %v1603_v19 = vadd.f32 %v1595_v62, %v2776_v4  ;;  %v1661_v29 = vadd.f32 %v1653_v23, %v2776_v4 }
 0x1aa   : > { %v1628_v37 = vsel %vm1612_vm10, %v1604_v36, %v1620_v12  ;;  %v1602_v35 = vadd.f32 %v1594_v47, %v2776_v4  ;;  %v1660_v40 = vadd.f32 %v1652_v6, %v2776_v4  ;;  %v1601_v38 = vadd.f32 %v1593_v27, %v2776_v4 }
 0x1ab   : > { %1764 = vmatpush.msrb.mxu0 %v1629_v34  ;;  %1802 = vmatpush.msrb.mxu1 %v1687_v14  ;;  %v1686_v41 = vsel %vm1670_vm11, %v1662_v55, %v1678_v28  ;;  %vm1611_vm12 = vcmp.ge.f32.partialorder %v1603_v19, 0.0  ;;  %v1619_v42 = vmul.f32 0.2, %v1603_v19  ;;  %vm1669_vm13 = vcmp.ge.f32.partialorder %v1661_v29, 0.0 }
 0x1ac   : > { %v1677_v43 = vmul.f32 0.2, %v1661_v29  ;;  %vm1610_vm14 = vcmp.ge.f32.partialorder %v1602_v35, 0.0  ;;  %v1618_v44 = vmul.f32 0.2, %v1602_v35  ;;  %vm1668_vm15 = vcmp.ge.f32.partialorder %v1660_v40, 0.0 }
 0x1ad   : > { %1765 = vmatpush.msrb.mxu0 %v1628_v37  ;;  %1803 = vmatpush.msrb.mxu1 %v1686_v41  ;;  %v1627_v50 = vsel %vm1611_vm12, %v1603_v19, %v1619_v42  ;;  %v1676_v51 = vmul.f32 0.2, %v1660_v40  ;;  %vm1609_vm0 = vcmp.ge.f32.partialorder %v1601_v38, 0.0  ;;  %v1617_v46 = vmul.f32 0.2, %v1601_v38  ;;  %v1715_v42 = vld [vmem:[%s2895_s5 + $0x28] sm:$0xff] }
 0x1ae   : > { %v1685_v54 = vsel %vm1669_vm13, %v1661_v29, %v1677_v43  ;;  %v1626_v57 = vsel %vm1610_vm14, %v1602_v35, %v1618_v44  ;;  %v1659_v58 = vadd.f32 %v1651_v31, %v2776_v4  ;;  %v1592_v61 = vmul.f32 %v2761_v52, %v2634_v56  ;;  %v1712_v43 = vld [vmem:[%s2895_s5 + $0x10] sm:$0xff]  ;;  %v1717_v44 = vld [vmem:[%s2895_s5 + $0x38] sm:$0xff] }
 0x1af   : > { %1766 = vmatpush.msrb.mxu0 %v1627_v50  ;;  %1804 = vmatpush.msrb.mxu1 %v1685_v54  ;;  %v1684_v1 = vsel %vm1668_vm15, %v1660_v40, %v1676_v51  ;;  %v1625_v53 = vsel %vm1609_vm0, %v1601_v38, %v1617_v46  ;;  %v1650_v63 = vmul.f32 %v2761_v52, %v2686_v9  ;;  %vm1746_vm8 = vcmask 654336   ;;  %v1714_v50 = vld [vmem:[%s2895_s5 + $0x20] sm:$0xff]  ;;  %v1719_v51 = vld [vmem:[%s2895_s5 + $0x48] sm:$0xf]  ;;  %v1716_v46 = vld [vmem:[%s2895_s5 + $0x30] sm:$0xff] }
 0x1b0   : > { %vm1667_vm1 = vcmp.ge.f32.partialorder %v1659_v58, 0.0  ;;  %v1675_v5 = vmul.f32 0.2, %v1659_v58  ;;  %v1600_v11 = vadd.f32 %v1592_v61, %v2776_v4  ;;  %v1540_v62 = vmul.f32 %v2761_v52, %v2630_v48  ;;  %v1718_v54 = vld [vmem:[%s2895_s5 + $0x40] sm:$0xf] }
 0x1b1   : > { %1767 = vmatpush.msrb.mxu0 %v1626_v57  ;;  %1805 = vmatpush.msrb.mxu1 %v1684_v1  ;;  %v1658_v23 = vadd.f32 %v1650_v63, %v2776_v4  ;;  %v1649_v56 = vmul.f32 %v2761_v52, %v2684_v33  ;;  %v1539_v47 = vmul.f32 %v2761_v52, %v2626_v39 }
 0x1b2   : > { %v1683_v6 = vsel %vm1667_vm1, %v1659_v58, %v1675_v5  ;;  %vm1608_vm2 = vcmp.ge.f32.partialorder %v1600_v11, 0.0  ;;  %v1616_v9 = vmul.f32 0.2, %v1600_v11  ;;  %v1551_v27 = vadd.f32 %v2776_v4, %v1540_v62 }
 0x1b3   : > { %1768 = vmatpush.msrb.mxu0 %v1625_v53  ;;  %1806 = vmatpush.msrb.mxu1 %v1683_v6  ;;  %vm1666_vm3 = vcmp.ge.f32.partialorder %v1658_v23, 0.0  ;;  %v1674_v31 = vmul.f32 0.2, %v1658_v23  ;;  %v1657_v48 = vadd.f32 %v1649_v56, %v2776_v4  ;;  %v1550_v59 = vadd.f32 %v2776_v4, %v1539_v47 }
 0x1b4   : > { %v1624_v8 = vsel %vm1608_vm2, %v1600_v11, %v1616_v9  ;;  %vm1559_vm4 = vcmp.ge.f32.partialorder %v1551_v27, 0.0  ;;  %v1567_v18 = vmul.f32 0.2, %v1551_v27  ;;  %v1648_v33 = vmul.f32 %v2761_v52, %v2682_v24 }
 0x1b5   : > { %1769 = vmatpush.msrb.mxu0 %v1624_v8  ;;  %v1682_v39 = vsel %vm1666_vm3, %v1658_v23, %v1674_v31  ;;  %vm1665_vm5 = vcmp.ge.f32.partialorder %v1657_v48, 0.0  ;;  %v1673_v45 = vmul.f32 0.2, %v1657_v48  ;;  %vm1558_vm6 = vcmp.ge.f32.partialorder %v1550_v59, 0.0 }
 0x1b6   : > { %1807 = vmatpush.msrb.mxu1 %v1682_v39  ;;  %v1575_v7 = vsel %vm1559_vm4, %v1551_v27, %v1567_v18  ;;  %v1566_v10 = vmul.f32 0.2, %v1550_v59  ;;  %v1656_v36 = vadd.f32 %v1648_v33, %v2776_v4  ;;  %v1538_v55 = vmul.f32 %v2761_v52, %v2620_v32 }
 0x1b7   : > { %1770 = vmatpush.msrb.mxu0 %v1575_v7  ;;  %v1681_v2 = vsel %vm1665_vm5, %v1657_v48, %v1673_v45  ;;  %v1537_v21 = vmul.f32 %v2761_v52, %v2609_v20  ;;  %v1536_v24 = vmul.f32 %v2761_v52, %v2603_v13  ;;  %v1535_v16 = vmul.f32 %v2761_v52, %v2598_v3  ;;  %v1711_v13 = vld [vmem:[%s2895_s5 + $0x8] sm:$0xff] }
 0x1b8   : > { %1808 = vmatpush.msrb.mxu1 %v1681_v2  ;;  %v1574_v17 = vsel %vm1558_vm6, %v1550_v59, %v1566_v10  ;;  %vm1664_vm7 = vcmp.ge.f32.partialorder %v1656_v36, 0.0  ;;  %v1672_v22 = vmul.f32 0.2, %v1656_v36  ;;  %v1549_v25 = vadd.f32 %v2776_v4, %v1538_v55 }
 0x1b9   : > { %1771 = vmatpush.msrb.mxu0 %v1574_v17  ;;  %v1548_v32 = vadd.f32 %v2776_v4, %v1537_v21  ;;  %v1547_v0 = vadd.f32 %v2776_v4, %v1536_v24  ;;  %v1546_v15 = vadd.f32 %v2776_v4, %v1535_v16  ;;  %v1534_v30 = vmul.f32 %v2761_v52, %v2592_v60 }
 0x1ba   : > { %v1680_v20 = vsel %vm1664_vm7, %v1656_v36, %v1672_v22  ;;  %vm1557_vm9 = vcmp.ge.f32.partialorder %v1549_v25, 0.0  ;;  %v1565_v3 = vmul.f32 0.2, %v1549_v25  ;;  %v1533_v34 = vmul.f32 %v2761_v52, %v2584_v49  ;;  %v1713_v49 = vld [vmem:[%s2895_s5 + $0x18] sm:$0xff] }
 0x1bb   : > { %1809 = vmatpush.msrb.mxu1 %v1680_v20  ;;  %vm1556_vm10 = vcmp.ge.f32.partialorder %v1548_v32, 0.0  ;;  %v1564_v26 = vmul.f32 0.2, %v1548_v32  ;;  %v1563_v14 = vmul.f32 0.2, %v1547_v0  ;;  %v1545_v28 = vadd.f32 %v2776_v4, %v1534_v30 }
 0x1bc   : > { %v1573_v12 = vsel %vm1557_vm9, %v1549_v25, %v1565_v3  ;;  %2289 = vmatmul.msk.f32.vlgmr.msrb.gmra.mxu1 %vm1746_vm8, %v1711_v13  ;;  %vm1555_vm11 = vcmp.ge.f32.partialorder %v1547_v0, 0.0  ;;  %v1544_v19 = vadd.f32 %v2776_v4, %v1533_v34  ;;  %v1562_v37 = vmul.f32 0.2, %v1546_v15  ;;  %v1710_v4 = vld [vmem:[%s2895_s5] sm:$0xff] }
 0x1bd   : > { %1772 = vmatpush.msrb.mxu0 %v1573_v12  ;;  %v1572_v29 = vsel %vm1556_vm10, %v1548_v32, %v1564_v26  ;;  %vm1554_vm12 = vcmp.ge.f32.partialorder %v1546_v15, 0.0  ;;  %v1571_v60 = vsel %vm1555_vm11, %v1547_v0, %v1563_v14  ;;  %v1561_v35 = vmul.f32 0.2, %v1545_v28 }
 0x1be   : > { %vm1553_vm13 = vcmp.ge.f32.partialorder %v1545_v28, 0.0  ;;  %v1570_v52 = vsel %vm1554_vm12, %v1546_v15, %v1562_v37  ;;  %v1560_v40 = vmul.f32 0.2, %v1544_v19  ;;  %vm1552_vm14 = vcmp.ge.f32.partialorder %v1544_v19, 0.0 }
 0x1bf   : > { %1773 = vmatpush.msrb.mxu0 %v1572_v29  ;;  %v1569_v38 = vsel %vm1553_vm13, %v1545_v28, %v1561_v35 }
 0x1c0   : > { %v1568_v41 = vsel %vm1552_vm14, %v1544_v19, %v1560_v40 }
 0x1c1   : > { %1774 = vmatpush.msrb.mxu0 %v1571_v60 }
 0x1c3   : > { %1775 = vmatpush.msrb.mxu0 %v1570_v52 }
 0x1c4   : > { %2290 = vmatmul.msk.f32.gmra.mxu1 %vm1746_vm8, %v1713_v49 }
 0x1c5   : > { %1776 = vmatpush.msrb.mxu0 %v1569_v38 }
 0x1c7   : > { %1777 = vmatpush.msrb.mxu0 %v1568_v41 }
 0x1c8   : > { %1778 = vmatmul.f32.vlgmr.msrb.gmra.mxu0 %v1710_v4 }
 0x1cc   : > { %2291 = vmatmul.msk.f32.gmra.mxu1 %vm1746_vm8, %v1715_v42 }
 0x1d0   : > { %1781 = vmatmul.f32.gmra.mxu0 %v1712_v43 }
 0x1d4   : > { %2292 = vmatmul.msk.f32.gmra.mxu1 %vm1746_vm8, %v1717_v44 }
 0x1d8   : > { %1784 = vmatmul.f32.gmra.mxu0 %v1714_v50 }
 0x1dc   : > { %2293 = vmatmul.msk.f32.gmra.mxu1 %vm1746_vm8, %v1719_v51 }
 0x1e0   : > { %1787 = vmatmul.f32.gmra.mxu0 %v1716_v46 }
 0x1e8   : > { %1790 = vmatmul.f32.gmra.mxu0 %v1718_v54 }
 0x239   : > { %v1811_v57 = vpop.f32.mrf.mxu1 }
 0x241   : > { %v1814_v61 = vpop.f32.mrf.mxu1 }
 0x245   : > { %v1779_v58 = vpop.f32.mrf.mxu0 }
 0x246   : > { %v1812_v53 = vadd.f32 %v1811_v57, %v1779_v58 }
 0x249   : > { %v1817_v5 = vpop.f32.mrf.mxu1 }
 0x24d   : > { %v1782_v1 = vpop.f32.mrf.mxu0 }
 0x24e   : > { %v1815_v63 = vadd.f32 %v1814_v61, %v1782_v1 }
 0x250   : > { %v2359_v11 = vpack.c.bf16 %v1815_v63, %v1812_v53 }
 0x251   : > { %v1820_v23 = vpop.f32.mrf.mxu1 }
 0x252   : > { %2360 = vst [vmem:[%s330_s24] sm:$0xff] %v2359_v11  }
 0x255   : > { %v1785_v62 = vpop.f32.mrf.mxu0 }
 0x256   : > { %v1818_v47 = vadd.f32 %v1817_v5, %v1785_v62 }
 0x259   : > { %v1823_v27 = vpop.f32.mrf.mxu1 }
 0x25d   : > { %v1788_v56 = vpop.f32.mrf.mxu0 }
 0x25e   : > { %v1821_v6 = vadd.f32 %v1820_v23, %v1788_v56 }
 0x260   : > { %v2364_v9 = vpack.c.bf16 %v1821_v6, %v1818_v47 }
 0x262   : > { %2366 = vst [vmem:[%s330_s24 + $0x8] sm:$0xff] %v2364_v9  }
 0x265   : > { %v1791_v31 = vpop.f32.mrf.mxu0 }
 0x266   : > { %v1824_v48 = vadd.f32 %v1823_v27, %v1791_v31 }
 0x268   : > { %v1830_v59 = vpack.c.bf16 %v1824_v48, %v1824_v48 }
 0x26a   : > { %1835 = vst [vmem:[%s330_s24 + $0x10] sm:$0x3] %v1830_v59 }
 0x26b PF: > { %s16_s23 = sadd.s32 1, %s2416_s23   ;;  %s2897_s21 = smov %s2412_s22 }
 0x26c   : > { %p13_p5 = scmp.ge.s32.totalorder %s16_s23, 4   ;;  %s2898_s22 = smov %s2900_s2 }
 0x26e   :  { %15 = sbr.rel (!%p13_p5) target bundleno = 2 (0x2), region = 89 }

</bundles_post_ra>
